<compile_context>
chip_gen: v5e
topology: v5e:2x2
jax: 0.10.0
libtpu: 0.0.40
codegen_flags: <defaults>
</compile_context>

<pallas_src>
import functools

import jax
import jax.numpy as jnp
from jax.experimental import pallas as pl
from jax.experimental.pallas import tpu as pltpu


_PAD = 128  # spare lanes on each side of the flattened-input VMEM scratch
_LAYER_ORDER = ("conv1", "relu", "pool", "fc")


# ------------------------------ Pallas kernel ------------------------------ #

def _fused_stem_kernel(x_ref, wk_ref, mask_ref, spool_ref, wfc_ref, bfc_ref,
                       conv_ref, pool_ref, fc_ref, *rest,
                       Cin, Cout, H, W, spb, pad, want_relu):
    """Fused conv1(3x3,'same') + bias + ReLU + 2x2 avg-pool + fc for one block
    of `spb` samples stacked along the lane axis.

    x_ref    : (Cin, L)         flattened samples, L = spb*H*W
    wk_ref   : (Cout, Kp)       bf16 conv weights: 9 taps * Cin, bias col, pad
    mask_ref : (9, L)           per-tap {0,1} edge masks (sample/row/col edges)
    spool_ref: (L, Lp)          block-diagonal 2x2 avg-pool selection matrix
    wfc_ref  : (fc_in, fc_out)  fc weight, pre-transposed ([in, out])
    bfc_ref  : (1, fc_out)      fc bias
    conv_ref : (Cout, L)        raw conv1 output (lane-dense, NCHW-flat)
    pool_ref : (Cout, Lp)       relu+pool output (lane-dense, Lp = spb*PoolP)
    fc_ref   : (1, spb, fc_out) fc output for this block
    relu_ref : (Cout, L)        optional (only when 'relu' is extracted)
    scratch  : xpad (Cin, L+2*pad), col (Kp, L) bf16, xfc (spb, fc_in)
    """
    if want_relu:
        relu_ref, xpad, col, xfc = rest
    else:
        relu_ref = None
        xpad, col, xfc = rest

    P = H * W
    L = spb * P
    PoolP = (H // 2) * (W // 2)
    Kc = 9 * Cin            # conv-tap rows of the im2col block
    Kp = col.shape[0]       # padded contraction length (bias row + bf16 pad)

    # Stage this block's samples (flattened, lane-stacked) into a VMEM scratch
    # with `pad` spare lanes on each side, so every 3x3 tap below is an
    # in-bounds lane-shifted read of resident data (no HBM im2col).  The pad
    # lanes are never consumed un-masked, so they are not zeroed at all.
    xpad[:, pl.ds(pad, L)] = x_ref[...]

    # Bias row (consumed by the bias column of wk) + bf16-packing pad row
    # (consumed by a zero weight column).  Tiny store, done every step so the
    # kernel stays correct when the parallel grid is sharded across cores.
    col[pl.ds(Kc, Kp - Kc), :] = jnp.ones((Kp - Kc, L), col.dtype)

    # Build the (Kp, L) im2col block: tap t = (di+1)*3 + (dj+1) fills rows
    # [t*Cin, (t+1)*Cin).  Edge handling uses the precomputed per-tap masks
    # via jnp.where, so reads that land in a neighbouring sample or in the
    # uninitialised pad lanes never leak into the result.
    for di in (-1, 0, 1):
        for dj in (-1, 0, 1):
            t = (di + 1) * 3 + (dj + 1)
            tap = xpad[:, pl.ds(pad + di * W + dj, L)]
            if not (di == 0 and dj == 0):
                keep = mask_ref[pl.ds(t, 1), :] != 0.0
                tap = jnp.where(keep, tap, 0.0)
            col[pl.ds(t * Cin, Cin), :] = tap.astype(col.dtype)

    # conv1 + bias as ONE MXU matmul over K = 9*Cin+1 (bias folded via the
    # ones row); bf16 operands, f32 accumulation.  Output (Cout, L) is
    # lane-dense and already in channels-on-sublane / NCHW-flat lane order.
    conv = jnp.dot(wk_ref[...], col[...], preferred_element_type=jnp.float32)
    conv_ref[...] = conv

    relu = jnp.maximum(conv, 0.0)
    if want_relu:
        relu_ref[...] = relu    # only materialized when 'relu' is extracted

    # 2x2 average pool as one matmul against the block-diagonal selection
    # matrix; pooled block is (Cout, spb*PoolP) -> lane-dense (>= 128 lanes).
    pooled = jnp.dot(relu, spool_ref[...], preferred_element_type=jnp.float32)
    pool_ref[...] = pooled

    # Fused fc: rearrange pooled into the per-sample NCHW flatten
    # (spb, Cout*PoolP) with spb*Cout tiny VMEM row copies, then one
    # (spb, fc_in) @ (fc_in, fc_out) matmul with the bias broadcast-added.
    for n in range(spb):
        for c in range(Cout):
            xfc[pl.ds(n, 1), pl.ds(c * PoolP, PoolP)] = (
                pooled[c:c + 1, n * PoolP:(n + 1) * PoolP])
    fc_ref[0] = (jnp.dot(xfc[...], wfc_ref[...],
                         preferred_element_type=jnp.float32)
                 + bfc_ref[...])


# ------------------------------- wrappers ---------------------------------- #

def _make_pool_matrix(H, W, spb):
    """Block-diagonal (spb*H*W, spb*Ho*Wo) matrix: 0.25 at each 2x2 window."""
    P, Ho, Wo = H * W, H // 2, W // 2
    PoolP = Ho * Wo
    p = jnp.arange(spb * P)
    n, pp = p // P, p % P
    q = n * PoolP + ((pp // W) // 2) * Wo + (pp % W) // 2
    sel = q[:, None] == jnp.arange(spb * PoolP)[None, :]
    return sel.astype(jnp.float32) * 0.25


def _make_tap_masks(H, W, spb):
    """(9, spb*H*W) {0,1} masks: tap (di,dj) is zeroed at image edges, which
    also kills every read that crosses a sample boundary or lands in pad."""
    P = H * W
    lane = jnp.arange(spb * P)
    r = (lane // W) % H
    c = lane % W
    masks = []
    for di in (-1, 0, 1):
        for dj in (-1, 0, 1):
            m = jnp.ones_like(lane, dtype=jnp.bool_)
            if di == -1:
                m = m & (r != 0)
            if di == 1:
                m = m & (r != H - 1)
            if dj == -1:
                m = m & (c != 0)
            if dj == 1:
                m = m & (c != W - 1)
            masks.append(m)
    return jnp.stack(masks).astype(jnp.float32)


@functools.partial(jax.jit, static_argnames=("want_relu",))
def fused_stem_forward(x, conv_w, conv_b, fc_w_t, fc_b, *, want_relu):
    """Runs the whole conv1 -> relu -> pool -> fc stem in one pallas_call and
    returns every layer's activation in NCHW / (N, fc_out) layout."""
    N, Cin, H, W = x.shape
    Cout = conv_w.shape[0]
    P, Ho, Wo = H * W, H // 2, W // 2
    PoolP = Ho * Wo
    fc_in, fc_out = fc_w_t.shape
    assert H % 2 == 0 and W % 2 == 0
    assert fc_in == Cout * PoolP
    assert W + 1 <= _PAD, "image width too large for the fixed scratch padding"

    # Samples per block: batch enough samples along the lane axis that both
    # the conv and pooled outputs are lane-dense (multiples of 128 lanes); at
    # these sizes the whole batch fits in one block.  With larger batches the
    # leading block axis stays a "parallel" grid dimension (v7x: 2 TCs).
    spb = N
    for cand in range(1, N):
        if (N % cand == 0 and cand * PoolP >= 128
                and (cand * P) % 128 == 0 and (cand * PoolP) % 128 == 0):
            spb = cand
            break
    nblk = N // spb
    L, Lp = spb * P, spb * PoolP
    Kc = 9 * Cin
    Kp = Kc + 1 + ((Kc + 1) % 2)        # bias row + pad to even for bf16 pack

    # ---- operand prep (layout plumbing, done once in XLA) ----
    x_l = x.transpose(1, 0, 2, 3).reshape(Cin, N * P)      # samples on lanes
    w_flat = conv_w.transpose(0, 2, 3, 1).reshape(Cout, Kc)
    wk = jnp.concatenate(
        [w_flat, conv_b[:, None],
         jnp.zeros((Cout, Kp - Kc - 1), conv_w.dtype)],
        axis=1).astype(jnp.bfloat16)                        # (Cout, Kp)
    tapmask = _make_tap_masks(H, W, spb)                    # (9, L)
    spool = _make_pool_matrix(H, W, spb)                    # (L, Lp)
    bfc = fc_b.reshape(1, fc_out)

    kernel = functools.partial(_fused_stem_kernel, Cin=Cin, Cout=Cout,
                               H=H, W=W, spb=spb, pad=_PAD,
                               want_relu=want_relu)

    out_shape = [jax.ShapeDtypeStruct((Cout, N * P), jnp.float32),      # conv1
                 jax.ShapeDtypeStruct((Cout, N * PoolP), jnp.float32),  # pool
                 jax.ShapeDtypeStruct((nblk, spb, fc_out), jnp.float32)]  # fc
    out_specs = [pl.BlockSpec((Cout, L), lambda i: (0, i)),
                 pl.BlockSpec((Cout, Lp), lambda i: (0, i)),
                 pl.BlockSpec((1, spb, fc_out), lambda i: (i, 0, 0))]
    if want_relu:
        out_shape.append(jax.ShapeDtypeStruct((Cout, N * P), jnp.float32))
        out_specs.append(pl.BlockSpec((Cout, L), lambda i: (0, i)))

    results = pl.pallas_call(
        kernel,
        out_shape=tuple(out_shape),
        grid=(nblk,),
        in_specs=[
            pl.BlockSpec((Cin, L), lambda i: (0, i)),          # x (lane block)
            pl.BlockSpec((Cout, Kp), lambda i: (0, 0)),        # conv w + bias
            pl.BlockSpec((9, L), lambda i: (0, 0)),            # tap edge masks
            pl.BlockSpec((L, Lp), lambda i: (0, 0)),           # pool matrix
            pl.BlockSpec((fc_in, fc_out), lambda i: (0, 0)),   # fc weight
            pl.BlockSpec((1, fc_out), lambda i: (0, 0)),       # fc bias
        ],
        out_specs=tuple(out_specs),
        scratch_shapes=[
            pltpu.VMEM((Cin, L + 2 * _PAD), jnp.float32),      # padded input
            pltpu.VMEM((Kp, L), jnp.bfloat16),                 # im2col block
            pltpu.VMEM((spb, fc_in), jnp.float32),             # fc activations
        ],
        compiler_params=pltpu.CompilerParams(
            dimension_semantics=("parallel",)),
    )(x_l, wk, tapmask, spool, fc_w_t, bfc)

    conv_l, pool_l, fc_blk = results[0], results[1], results[2]
    acts = {
        "conv1": conv_l.reshape(Cout, N, H, W).transpose(1, 0, 2, 3),
        "pool": pool_l.reshape(Cout, N, Ho, Wo).transpose(1, 0, 2, 3),
        "fc": fc_blk.reshape(N, fc_out),
    }
    if want_relu:
        acts["relu"] = results[3].reshape(Cout, N, H, W).transpose(1, 0, 2, 3)
    return acts


# ---------------------- FeatureExtractor semantics -------------------------- #

def feature_extractor_forward(x, params, extracted_layers):
    """Mirrors FeatureExtractor.forward over a conv1->relu->pool->fc stem:
    iterate the submodule's children in order, flatten before 'fc', and
    collect outputs per the extraction rule.  All four layers come out of one
    fused Pallas call; 'relu' is only materialized in HBM when it is itself
    requested (otherwise its value only feeds the fused pool)."""
    want_relu = extracted_layers is None or "relu" in extracted_layers
    acts = fused_stem_forward(x, params["conv1_w"], params["conv1_b"],
                              params["fc_w_t"], params["fc_b"],
                              want_relu=want_relu)
    outputs = {}
    for name in _LAYER_ORDER:
        # (x is flattened before 'fc' inside the fused kernel; PyTorch's
        #  per-layer `print(name)` is omitted to keep stdout clean.)
        if extracted_layers is None or (name in extracted_layers
                                        and "fc" not in name):
            outputs[name] = acts[name]
    return outputs


# --------------------------------- main ------------------------------------ #

if __name__ == "__main__":
    key = jax.random.PRNGKey(0)
    k1, k2, k3, k4, k5 = jax.random.split(key, 5)

    N, Cin, H, W = 2, 4, 16, 16
    Cout = 8
    fc_in = Cout * (H // 2) * (W // 2)   # 8 * 8 * 8 = 512
    fc_out = 16

    x = jax.random.normal(k1, (N, Cin, H, W), jnp.float32)
    params = {
        "conv1_w": jax.random.normal(k2, (Cout, Cin, 3, 3), jnp.float32) * 0.1,
        "conv1_b": jax.random.normal(k3, (Cout,), jnp.float32) * 0.1,
        # fc weight stored pre-transposed ([in, out]) so the forward pass never
        # re-transposes it (PyTorch's nn.Linear stores [out, in]).
        "fc_w_t": jax.random.normal(k4, (fc_in, fc_out), jnp.float32) * 0.05,
        "fc_b": jax.random.normal(k5, (fc_out,), jnp.float32) * 0.05,
    }

    extracted_layers = ["conv1", "pool", "fc"]   # 'fc' is excluded by the rule
    outputs = jax.block_until_ready(
        feature_extractor_forward(x, params, extracted_layers))

    assert set(outputs.keys()) == {"conv1", "pool"}
    assert outputs["conv1"].shape == (N, Cout, H, W)
    assert outputs["pool"].shape == (N, Cout, H // 2, W // 2)

    # Pure-XLA reference check of the fused conv + bias + relu + pool + fc.
    conv_expected = jax.lax.conv_general_dilated(
        x, params["conv1_w"], window_strides=(1, 1), padding="SAME",
        dimension_numbers=("NCHW", "OIHW", "NCHW"),
    ) + params["conv1_b"].reshape(1, Cout, 1, 1)
    relu_expected = jnp.maximum(conv_expected, 0.0)
    pool_expected = relu_expected.reshape(
        N, Cout, H // 2, 2, W // 2, 2).mean(axis=(3, 5))
    assert jnp.allclose(outputs["conv1"], conv_expected, atol=2e-2, rtol=2e-2)
    assert jnp.allclose(outputs["pool"], pool_expected, atol=2e-2, rtol=2e-2)

    # Also exercise the extracted_layers=None path (collects every child,
    # including 'relu' and 'fc', exactly like the PyTorch module).
    outputs_all = jax.block_until_ready(
        feature_extractor_forward(x, params, None))
    assert set(outputs_all.keys()) == {"conv1", "relu", "pool", "fc"}
    assert outputs_all["fc"].shape == (N, fc_out)
    fc_expected = pool_expected.reshape(N, -1) @ params["fc_w_t"] + params["fc_b"]
    assert jnp.allclose(outputs_all["relu"], relu_expected, atol=2e-2, rtol=2e-2)
    assert jnp.allclose(outputs_all["fc"], fc_expected, atol=2e-2, rtol=2e-2)
    assert all(bool(jnp.all(jnp.isfinite(v))) for v in outputs_all.values())

    print("KERNEL_OK")
</pallas_src>

<mosaic_0001>
module attributes {stable_mosaic.version = 11 : i64} {
  func.func @_fused_stem_kernel(%arg0: i32, %arg1: memref<4x512xf32, #tpu.memory_space<vmem>>, %arg2: memref<8x38xbf16, #tpu.memory_space<vmem>>, %arg3: memref<9x512xf32, #tpu.memory_space<vmem>>, %arg4: memref<512x128xf32, #tpu.memory_space<vmem>>, %arg5: memref<512x16xf32, #tpu.memory_space<vmem>>, %arg6: memref<1x16xf32, #tpu.memory_space<vmem>>, %arg7: memref<8x512xf32, #tpu.memory_space<vmem>>, %arg8: memref<8x128xf32, #tpu.memory_space<vmem>>, %arg9: memref<1x2x16xf32, #tpu.memory_space<vmem>>, %arg10: memref<4x768xf32, #tpu.memory_space<vmem>>, %arg11: memref<38x512xbf16, #tpu.memory_space<vmem>>, %arg12: memref<2x512xf32, #tpu.memory_space<vmem>>) attributes {dimension_semantics = [#tpu.dimension_semantics<parallel>], iteration_bounds = array<i64: 1>, scalar_prefetch = 0 : i64, scratch_operands = 3 : i64, tpu.core_type = #tpu.core_type<tc>, window_params = [{transform_indices = @transform_0, window_bounds = array<i64: 4, 512>}, {pipeline_mode = #tpu.pipeline_mode<synchronous>, transform_indices = @transform_1, window_bounds = array<i64: 8, 38>}, {pipeline_mode = #tpu.pipeline_mode<synchronous>, transform_indices = @transform_2, window_bounds = array<i64: 9, 512>}, {pipeline_mode = #tpu.pipeline_mode<synchronous>, transform_indices = @transform_3, window_bounds = array<i64: 512, 128>}, {pipeline_mode = #tpu.pipeline_mode<synchronous>, transform_indices = @transform_4, window_bounds = array<i64: 512, 16>}, {pipeline_mode = #tpu.pipeline_mode<synchronous>, transform_indices = @transform_5, window_bounds = array<i64: 1, 16>}, {transform_indices = @transform_6, window_bounds = array<i64: 8, 512>}, {transform_indices = @transform_7, window_bounds = array<i64: 8, 128>}, {transform_indices = @transform_8, window_bounds = array<i64: 1, 2, 16>}]} {
    %c0 = arith.constant 0 : index
    %c0_0 = arith.constant 0 : index
    %0 = vector.load %arg1[%c0, %c0_0] : memref<4x512xf32, #tpu.memory_space<vmem>>, vector<4x512xf32>
    %c0_1 = arith.constant 0 : index
    %c128 = arith.constant 128 : index
    %1 = vector.load %arg10[%c0_1, %c128] : memref<4x768xf32, #tpu.memory_space<vmem>>, vector<4x512xf32>
    tpu.vector_store %arg10[%c0_1, %c128], %0 {strides = array<i32>} : memref<4x768xf32, #tpu.memory_space<vmem>>, vector<4x512xf32>,
    %cst = arith.constant 1.000000e+00 : bf16
    %2 = vector.broadcast %cst : bf16 to vector<2x512xbf16>
    %c36 = arith.constant 36 : index
    %c0_2 = arith.constant 0 : index
    %3 = vector.load %arg11[%c36, %c0_2] : memref<38x512xbf16, #tpu.memory_space<vmem>>, vector<2x512xbf16>
    tpu.vector_store %arg11[%c36, %c0_2], %2 {strides = array<i32>} : memref<38x512xbf16, #tpu.memory_space<vmem>>, vector<2x512xbf16>,
    %c0_3 = arith.constant 0 : index
    %c111 = arith.constant 111 : index
    %4 = vector.load %arg10[%c0_3, %c111] : memref<4x768xf32, #tpu.memory_space<vmem>>, vector<4x512xf32>
    %c0_4 = arith.constant 0 : index
    %c0_5 = arith.constant 0 : index
    %5 = vector.load %arg3[%c0_4, %c0_5] : memref<9x512xf32, #tpu.memory_space<vmem>>, vector<1x512xf32>
    %cst_6 = arith.constant 0.000000e+00 : f32
    %6 = vector.broadcast %cst_6 : f32 to vector<1x512xf32>
    %7 = arith.cmpf one, %5, %6 : vector<1x512xf32>
    %cst_7 = arith.constant 0.000000e+00 : f32
    %8 = vector.shape_cast %7 : vector<1x512xi1> to vector<1x512xi1>
    %9 = vector.broadcast %8 : vector<1x512xi1> to vector<4x512xi1>
    %10 = vector.broadcast %cst_7 : f32 to vector<4x512xf32>
    %11 = arith.select %9, %4, %10 : vector<4x512xi1>, vector<4x512xf32>
    %12 = arith.truncf %11 : vector<4x512xf32> to vector<4x512xbf16>
    %c0_8 = arith.constant 0 : index
    %c0_9 = arith.constant 0 : index
    %13 = vector.load %arg11[%c0_8, %c0_9] : memref<38x512xbf16, #tpu.memory_space<vmem>>, vector<4x512xbf16>
    tpu.vector_store %arg11[%c0_8, %c0_9], %12 {strides = array<i32>} : memref<38x512xbf16, #tpu.memory_space<vmem>>, vector<4x512xbf16>,
    %c0_10 = arith.constant 0 : index
    %c112 = arith.constant 112 : index
    %14 = vector.load %arg10[%c0_10, %c112] : memref<4x768xf32, #tpu.memory_space<vmem>>, vector<4x512xf32>
    %c1 = arith.constant 1 : index
    %c0_11 = arith.constant 0 : index
    %15 = vector.load %arg3[%c1, %c0_11] : memref<9x512xf32, #tpu.memory_space<vmem>>, vector<1x512xf32>
    %cst_12 = arith.constant 0.000000e+00 : f32
    %16 = vector.broadcast %cst_12 : f32 to vector<1x512xf32>
    %17 = arith.cmpf one, %15, %16 : vector<1x512xf32>
    %cst_13 = arith.constant 0.000000e+00 : f32
    %18 = vector.shape_cast %17 : vector<1x512xi1> to vector<1x512xi1>
    %19 = vector.broadcast %18 : vector<1x512xi1> to vector<4x512xi1>
    %20 = vector.broadcast %cst_13 : f32 to vector<4x512xf32>
    %21 = arith.select %19, %14, %20 : vector<4x512xi1>, vector<4x512xf32>
    %22 = arith.truncf %21 : vector<4x512xf32> to vector<4x512xbf16>
    %c4 = arith.constant 4 : index
    %c0_14 = arith.constant 0 : index
    %23 = vector.load %arg11[%c4, %c0_14] : memref<38x512xbf16, #tpu.memory_space<vmem>>, vector<4x512xbf16>
    tpu.vector_store %arg11[%c4, %c0_14], %22 {strides = array<i32>} : memref<38x512xbf16, #tpu.memory_space<vmem>>, vector<4x512xbf16>,
    %c0_15 = arith.constant 0 : index
    %c113 = arith.constant 113 : index
    %24 = vector.load %arg10[%c0_15, %c113] : memref<4x768xf32, #tpu.memory_space<vmem>>, vector<4x512xf32>
    %c2 = arith.constant 2 : index
    %c0_16 = arith.constant 0 : index
    %25 = vector.load %arg3[%c2, %c0_16] : memref<9x512xf32, #tpu.memory_space<vmem>>, vector<1x512xf32>
    %cst_17 = arith.constant 0.000000e+00 : f32
    %26 = vector.broadcast %cst_17 : f32 to vector<1x512xf32>
    %27 = arith.cmpf one, %25, %26 : vector<1x512xf32>
    %cst_18 = arith.constant 0.000000e+00 : f32
    %28 = vector.shape_cast %27 : vector<1x512xi1> to vector<1x512xi1>
    %29 = vector.broadcast %28 : vector<1x512xi1> to vector<4x512xi1>
    %30 = vector.broadcast %cst_18 : f32 to vector<4x512xf32>
    %31 = arith.select %29, %24, %30 : vector<4x512xi1>, vector<4x512xf32>
    %32 = arith.truncf %31 : vector<4x512xf32> to vector<4x512xbf16>
    %c8 = arith.constant 8 : index
    %c0_19 = arith.constant 0 : index
    %33 = vector.load %arg11[%c8, %c0_19] : memref<38x512xbf16, #tpu.memory_space<vmem>>, vector<4x512xbf16>
    tpu.vector_store %arg11[%c8, %c0_19], %32 {strides = array<i32>} : memref<38x512xbf16, #tpu.memory_space<vmem>>, vector<4x512xbf16>,
    %c0_20 = arith.constant 0 : index
    %c127 = arith.constant 127 : index
    %34 = vector.load %arg10[%c0_20, %c127] : memref<4x768xf32, #tpu.memory_space<vmem>>, vector<4x512xf32>
    %c3 = arith.constant 3 : index
    %c0_21 = arith.constant 0 : index
    %35 = vector.load %arg3[%c3, %c0_21] : memref<9x512xf32, #tpu.memory_space<vmem>>, vector<1x512xf32>
    %cst_22 = arith.constant 0.000000e+00 : f32
    %36 = vector.broadcast %cst_22 : f32 to vector<1x512xf32>
    %37 = arith.cmpf one, %35, %36 : vector<1x512xf32>
    %cst_23 = arith.constant 0.000000e+00 : f32
    %38 = vector.shape_cast %37 : vector<1x512xi1> to vector<1x512xi1>
    %39 = vector.broadcast %38 : vector<1x512xi1> to vector<4x512xi1>
    %40 = vector.broadcast %cst_23 : f32 to vector<4x512xf32>
    %41 = arith.select %39, %34, %40 : vector<4x512xi1>, vector<4x512xf32>
    %42 = arith.truncf %41 : vector<4x512xf32> to vector<4x512xbf16>
    %c12 = arith.constant 12 : index
    %c0_24 = arith.constant 0 : index
    %43 = vector.load %arg11[%c12, %c0_24] : memref<38x512xbf16, #tpu.memory_space<vmem>>, vector<4x512xbf16>
    tpu.vector_store %arg11[%c12, %c0_24], %42 {strides = array<i32>} : memref<38x512xbf16, #tpu.memory_space<vmem>>, vector<4x512xbf16>,
    %c0_25 = arith.constant 0 : index
    %c128_26 = arith.constant 128 : index
    %44 = vector.load %arg10[%c0_25, %c128_26] : memref<4x768xf32, #tpu.memory_space<vmem>>, vector<4x512xf32>
    %45 = arith.truncf %44 : vector<4x512xf32> to vector<4x512xbf16>
    %c16 = arith.constant 16 : index
    %c0_27 = arith.constant 0 : index
    %46 = vector.load %arg11[%c16, %c0_27] : memref<38x512xbf16, #tpu.memory_space<vmem>>, vector<4x512xbf16>
    tpu.vector_store %arg11[%c16, %c0_27], %45 {strides = array<i32>} : memref<38x512xbf16, #tpu.memory_space<vmem>>, vector<4x512xbf16>,
    %c0_28 = arith.constant 0 : index
    %c129 = arith.constant 129 : index
    %47 = vector.load %arg10[%c0_28, %c129] : memref<4x768xf32, #tpu.memory_space<vmem>>, vector<4x512xf32>
    %c5 = arith.constant 5 : index
    %c0_29 = arith.constant 0 : index
    %48 = vector.load %arg3[%c5, %c0_29] : memref<9x512xf32, #tpu.memory_space<vmem>>, vector<1x512xf32>
    %cst_30 = arith.constant 0.000000e+00 : f32
    %49 = vector.broadcast %cst_30 : f32 to vector<1x512xf32>
    %50 = arith.cmpf one, %48, %49 : vector<1x512xf32>
    %cst_31 = arith.constant 0.000000e+00 : f32
    %51 = vector.shape_cast %50 : vector<1x512xi1> to vector<1x512xi1>
    %52 = vector.broadcast %51 : vector<1x512xi1> to vector<4x512xi1>
    %53 = vector.broadcast %cst_31 : f32 to vector<4x512xf32>
    %54 = arith.select %52, %47, %53 : vector<4x512xi1>, vector<4x512xf32>
    %55 = arith.truncf %54 : vector<4x512xf32> to vector<4x512xbf16>
    %c20 = arith.constant 20 : index
    %c0_32 = arith.constant 0 : index
    %56 = vector.load %arg11[%c20, %c0_32] : memref<38x512xbf16, #tpu.memory_space<vmem>>, vector<4x512xbf16>
    tpu.vector_store %arg11[%c20, %c0_32], %55 {strides = array<i32>} : memref<38x512xbf16, #tpu.memory_space<vmem>>, vector<4x512xbf16>,
    %c0_33 = arith.constant 0 : index
    %c143 = arith.constant 143 : index
    %57 = vector.load %arg10[%c0_33, %c143] : memref<4x768xf32, #tpu.memory_space<vmem>>, vector<4x512xf32>
    %c6 = arith.constant 6 : index
    %c0_34 = arith.constant 0 : index
    %58 = vector.load %arg3[%c6, %c0_34] : memref<9x512xf32, #tpu.memory_space<vmem>>, vector<1x512xf32>
    %cst_35 = arith.constant 0.000000e+00 : f32
    %59 = vector.broadcast %cst_35 : f32 to vector<1x512xf32>
    %60 = arith.cmpf one, %58, %59 : vector<1x512xf32>
    %cst_36 = arith.constant 0.000000e+00 : f32
    %61 = vector.shape_cast %60 : vector<1x512xi1> to vector<1x512xi1>
    %62 = vector.broadcast %61 : vector<1x512xi1> to vector<4x512xi1>
    %63 = vector.broadcast %cst_36 : f32 to vector<4x512xf32>
    %64 = arith.select %62, %57, %63 : vector<4x512xi1>, vector<4x512xf32>
    %65 = arith.truncf %64 : vector<4x512xf32> to vector<4x512xbf16>
    %c24 = arith.constant 24 : index
    %c0_37 = arith.constant 0 : index
    %66 = vector.load %arg11[%c24, %c0_37] : memref<38x512xbf16, #tpu.memory_space<vmem>>, vector<4x512xbf16>
    tpu.vector_store %arg11[%c24, %c0_37], %65 {strides = array<i32>} : memref<38x512xbf16, #tpu.memory_space<vmem>>, vector<4x512xbf16>,
    %c0_38 = arith.constant 0 : index
    %c144 = arith.constant 144 : index
    %67 = vector.load %arg10[%c0_38, %c144] : memref<4x768xf32, #tpu.memory_space<vmem>>, vector<4x512xf32>
    %c7 = arith.constant 7 : index
    %c0_39 = arith.constant 0 : index
    %68 = vector.load %arg3[%c7, %c0_39] : memref<9x512xf32, #tpu.memory_space<vmem>>, vector<1x512xf32>
    %cst_40 = arith.constant 0.000000e+00 : f32
    %69 = vector.broadcast %cst_40 : f32 to vector<1x512xf32>
    %70 = arith.cmpf one, %68, %69 : vector<1x512xf32>
    %cst_41 = arith.constant 0.000000e+00 : f32
    %71 = vector.shape_cast %70 : vector<1x512xi1> to vector<1x512xi1>
    %72 = vector.broadcast %71 : vector<1x512xi1> to vector<4x512xi1>
    %73 = vector.broadcast %cst_41 : f32 to vector<4x512xf32>
    %74 = arith.select %72, %67, %73 : vector<4x512xi1>, vector<4x512xf32>
    %75 = arith.truncf %74 : vector<4x512xf32> to vector<4x512xbf16>
    %c28 = arith.constant 28 : index
    %c0_42 = arith.constant 0 : index
    %76 = vector.load %arg11[%c28, %c0_42] : memref<38x512xbf16, #tpu.memory_space<vmem>>, vector<4x512xbf16>
    tpu.vector_store %arg11[%c28, %c0_42], %75 {strides = array<i32>} : memref<38x512xbf16, #tpu.memory_space<vmem>>, vector<4x512xbf16>,
    %c0_43 = arith.constant 0 : index
    %c145 = arith.constant 145 : index
    %77 = vector.load %arg10[%c0_43, %c145] : memref<4x768xf32, #tpu.memory_space<vmem>>, vector<4x512xf32>
    %c8_44 = arith.constant 8 : index
    %c0_45 = arith.constant 0 : index
    %78 = vector.load %arg3[%c8_44, %c0_45] : memref<9x512xf32, #tpu.memory_space<vmem>>, vector<1x512xf32>
    %cst_46 = arith.constant 0.000000e+00 : f32
    %79 = vector.broadcast %cst_46 : f32 to vector<1x512xf32>
    %80 = arith.cmpf one, %78, %79 : vector<1x512xf32>
    %cst_47 = arith.constant 0.000000e+00 : f32
    %81 = vector.shape_cast %80 : vector<1x512xi1> to vector<1x512xi1>
    %82 = vector.broadcast %81 : vector<1x512xi1> to vector<4x512xi1>
    %83 = vector.broadcast %cst_47 : f32 to vector<4x512xf32>
    %84 = arith.select %82, %77, %83 : vector<4x512xi1>, vector<4x512xf32>
    %85 = arith.truncf %84 : vector<4x512xf32> to vector<4x512xbf16>
    %c32 = arith.constant 32 : index
    %c0_48 = arith.constant 0 : index
    %86 = vector.load %arg11[%c32, %c0_48] : memref<38x512xbf16, #tpu.memory_space<vmem>>, vector<4x512xbf16>
    tpu.vector_store %arg11[%c32, %c0_48], %85 {strides = array<i32>} : memref<38x512xbf16, #tpu.memory_space<vmem>>, vector<4x512xbf16>,
    %c0_49 = arith.constant 0 : index
    %c0_50 = arith.constant 0 : index
    %87 = vector.load %arg2[%c0_49, %c0_50] : memref<8x38xbf16, #tpu.memory_space<vmem>>, vector<8x38xbf16>
    %c0_51 = arith.constant 0 : index
    %c0_52 = arith.constant 0 : index
    %88 = vector.load %arg11[%c0_51, %c0_52] : memref<38x512xbf16, #tpu.memory_space<vmem>>, vector<38x512xbf16>
    %cst_53 = arith.constant dense<0.000000e+00> : vector<8x512xf32>
    %89 = tpu.matmul %87, %88, %cst_53 {dimension_numbers = #tpu.dot_dimension_numbers<[1], [0], [0], [1], [0, 0, 1, 1], [], []>} : vector<8x38xbf16>, vector<38x512xbf16>, vector<8x512xf32> -> vector<8x512xf32>
    %c0_54 = arith.constant 0 : index
    %c0_55 = arith.constant 0 : index
    %90 = vector.load %arg7[%c0_54, %c0_55] : memref<8x512xf32, #tpu.memory_space<vmem>>, vector<8x512xf32>
    tpu.vector_store %arg7[%c0_54, %c0_55], %89 {strides = array<i32>} : memref<8x512xf32, #tpu.memory_space<vmem>>, vector<8x512xf32>,
    %cst_56 = arith.constant 0.000000e+00 : f32
    %91 = vector.broadcast %cst_56 : f32 to vector<8x512xf32>
    %92 = arith.maximumf %89, %91 : vector<8x512xf32>
    %c0_57 = arith.constant 0 : index
    %c0_58 = arith.constant 0 : index
    %93 = vector.load %arg4[%c0_57, %c0_58] : memref<512x128xf32, #tpu.memory_space<vmem>>, vector<512x128xf32>
    %cst_59 = arith.constant dense<0.000000e+00> : vector<8x128xf32>
    %94 = tpu.matmul %92, %93, %cst_59 {dimension_numbers = #tpu.dot_dimension_numbers<[1], [0], [0], [1], [0, 0, 1, 1], [], []>} : vector<8x512xf32>, vector<512x128xf32>, vector<8x128xf32> -> vector<8x128xf32>
    %c0_60 = arith.constant 0 : index
    %c0_61 = arith.constant 0 : index
    %95 = vector.load %arg8[%c0_60, %c0_61] : memref<8x128xf32, #tpu.memory_space<vmem>>, vector<8x128xf32>
    tpu.vector_store %arg8[%c0_60, %c0_61], %94 {strides = array<i32>} : memref<8x128xf32, #tpu.memory_space<vmem>>, vector<8x128xf32>,
    %96 = vector.extract_strided_slice %94 {offsets = [0, 0], sizes = [1, 64], strides = [1, 1]} : vector<8x128xf32> to vector<1x64xf32>
    %c0_62 = arith.constant 0 : index
    %c0_63 = arith.constant 0 : index
    %97 = vector.load %arg12[%c0_62, %c0_63] : memref<2x512xf32, #tpu.memory_space<vmem>>, vector<1x64xf32>
    tpu.vector_store %arg12[%c0_62, %c0_63], %96 {strides = array<i32>} : memref<2x512xf32, #tpu.memory_space<vmem>>, vector<1x64xf32>,
    %98 = vector.extract_strided_slice %94 {offsets = [1, 0], sizes = [1, 64], strides = [1, 1]} : vector<8x128xf32> to vector<1x64xf32>
    %c0_64 = arith.constant 0 : index
    %c64 = arith.constant 64 : index
    %99 = vector.load %arg12[%c0_64, %c64] : memref<2x512xf32, #tpu.memory_space<vmem>>, vector<1x64xf32>
    tpu.vector_store %arg12[%c0_64, %c64], %98 {strides = array<i32>} : memref<2x512xf32, #tpu.memory_space<vmem>>, vector<1x64xf32>,
    %100 = vector.extract_strided_slice %94 {offsets = [2, 0], sizes = [1, 64], strides = [1, 1]} : vector<8x128xf32> to vector<1x64xf32>
    %c0_65 = arith.constant 0 : index
    %c128_66 = arith.constant 128 : index
    %101 = vector.load %arg12[%c0_65, %c128_66] : memref<2x512xf32, #tpu.memory_space<vmem>>, vector<1x64xf32>
    tpu.vector_store %arg12[%c0_65, %c128_66], %100 {strides = array<i32>} : memref<2x512xf32, #tpu.memory_space<vmem>>, vector<1x64xf32>,
    %102 = vector.extract_strided_slice %94 {offsets = [3, 0], sizes = [1, 64], strides = [1, 1]} : vector<8x128xf32> to vector<1x64xf32>
    %c0_67 = arith.constant 0 : index
    %c192 = arith.constant 192 : index
    %103 = vector.load %arg12[%c0_67, %c192] : memref<2x512xf32, #tpu.memory_space<vmem>>, vector<1x64xf32>
    tpu.vector_store %arg12[%c0_67, %c192], %102 {strides = array<i32>} : memref<2x512xf32, #tpu.memory_space<vmem>>, vector<1x64xf32>,
    %104 = vector.extract_strided_slice %94 {offsets = [4, 0], sizes = [1, 64], strides = [1, 1]} : vector<8x128xf32> to vector<1x64xf32>
    %c0_68 = arith.constant 0 : index
    %c256 = arith.constant 256 : index
    %105 = vector.load %arg12[%c0_68, %c256] : memref<2x512xf32, #tpu.memory_space<vmem>>, vector<1x64xf32>
    tpu.vector_store %arg12[%c0_68, %c256], %104 {strides = array<i32>} : memref<2x512xf32, #tpu.memory_space<vmem>>, vector<1x64xf32>,
    %106 = vector.extract_strided_slice %94 {offsets = [5, 0], sizes = [1, 64], strides = [1, 1]} : vector<8x128xf32> to vector<1x64xf32>
    %c0_69 = arith.constant 0 : index
    %c320 = arith.constant 320 : index
    %107 = vector.load %arg12[%c0_69, %c320] : memref<2x512xf32, #tpu.memory_space<vmem>>, vector<1x64xf32>
    tpu.vector_store %arg12[%c0_69, %c320], %106 {strides = array<i32>} : memref<2x512xf32, #tpu.memory_space<vmem>>, vector<1x64xf32>,
    %108 = vector.extract_strided_slice %94 {offsets = [6, 0], sizes = [1, 64], strides = [1, 1]} : vector<8x128xf32> to vector<1x64xf32>
    %c0_70 = arith.constant 0 : index
    %c384 = arith.constant 384 : index
    %109 = vector.load %arg12[%c0_70, %c384] : memref<2x512xf32, #tpu.memory_space<vmem>>, vector<1x64xf32>
    tpu.vector_store %arg12[%c0_70, %c384], %108 {strides = array<i32>} : memref<2x512xf32, #tpu.memory_space<vmem>>, vector<1x64xf32>,
    %110 = vector.extract_strided_slice %94 {offsets = [7, 0], sizes = [1, 64], strides = [1, 1]} : vector<8x128xf32> to vector<1x64xf32>
    %c0_71 = arith.constant 0 : index
    %c448 = arith.constant 448 : index
    %111 = vector.load %arg12[%c0_71, %c448] : memref<2x512xf32, #tpu.memory_space<vmem>>, vector<1x64xf32>
    tpu.vector_store %arg12[%c0_71, %c448], %110 {strides = array<i32>} : memref<2x512xf32, #tpu.memory_space<vmem>>, vector<1x64xf32>,
    %112 = vector.extract_strided_slice %94 {offsets = [0, 64], sizes = [1, 64], strides = [1, 1]} : vector<8x128xf32> to vector<1x64xf32>
    %c1_72 = arith.constant 1 : index
    %c0_73 = arith.constant 0 : index
    %113 = vector.load %arg12[%c1_72, %c0_73] : memref<2x512xf32, #tpu.memory_space<vmem>>, vector<1x64xf32>
    tpu.vector_store %arg12[%c1_72, %c0_73], %112 {strides = array<i32>} : memref<2x512xf32, #tpu.memory_space<vmem>>, vector<1x64xf32>,
    %114 = vector.extract_strided_slice %94 {offsets = [1, 64], sizes = [1, 64], strides = [1, 1]} : vector<8x128xf32> to vector<1x64xf32>
    %c1_74 = arith.constant 1 : index
    %c64_75 = arith.constant 64 : index
    %115 = vector.load %arg12[%c1_74, %c64_75] : memref<2x512xf32, #tpu.memory_space<vmem>>, vector<1x64xf32>
    tpu.vector_store %arg12[%c1_74, %c64_75], %114 {strides = array<i32>} : memref<2x512xf32, #tpu.memory_space<vmem>>, vector<1x64xf32>,
    %116 = vector.extract_strided_slice %94 {offsets = [2, 64], sizes = [1, 64], strides = [1, 1]} : vector<8x128xf32> to vector<1x64xf32>
    %c1_76 = arith.constant 1 : index
    %c128_77 = arith.constant 128 : index
    %117 = vector.load %arg12[%c1_76, %c128_77] : memref<2x512xf32, #tpu.memory_space<vmem>>, vector<1x64xf32>
    tpu.vector_store %arg12[%c1_76, %c128_77], %116 {strides = array<i32>} : memref<2x512xf32, #tpu.memory_space<vmem>>, vector<1x64xf32>,
    %118 = vector.extract_strided_slice %94 {offsets = [3, 64], sizes = [1, 64], strides = [1, 1]} : vector<8x128xf32> to vector<1x64xf32>
    %c1_78 = arith.constant 1 : index
    %c192_79 = arith.constant 192 : index
    %119 = vector.load %arg12[%c1_78, %c192_79] : memref<2x512xf32, #tpu.memory_space<vmem>>, vector<1x64xf32>
    tpu.vector_store %arg12[%c1_78, %c192_79], %118 {strides = array<i32>} : memref<2x512xf32, #tpu.memory_space<vmem>>, vector<1x64xf32>,
    %120 = vector.extract_strided_slice %94 {offsets = [4, 64], sizes = [1, 64], strides = [1, 1]} : vector<8x128xf32> to vector<1x64xf32>
    %c1_80 = arith.constant 1 : index
    %c256_81 = arith.constant 256 : index
    %121 = vector.load %arg12[%c1_80, %c256_81] : memref<2x512xf32, #tpu.memory_space<vmem>>, vector<1x64xf32>
    tpu.vector_store %arg12[%c1_80, %c256_81], %120 {strides = array<i32>} : memref<2x512xf32, #tpu.memory_space<vmem>>, vector<1x64xf32>,
    %122 = vector.extract_strided_slice %94 {offsets = [5, 64], sizes = [1, 64], strides = [1, 1]} : vector<8x128xf32> to vector<1x64xf32>
    %c1_82 = arith.constant 1 : index
    %c320_83 = arith.constant 320 : index
    %123 = vector.load %arg12[%c1_82, %c320_83] : memref<2x512xf32, #tpu.memory_space<vmem>>, vector<1x64xf32>
    tpu.vector_store %arg12[%c1_82, %c320_83], %122 {strides = array<i32>} : memref<2x512xf32, #tpu.memory_space<vmem>>, vector<1x64xf32>,
    %124 = vector.extract_strided_slice %94 {offsets = [6, 64], sizes = [1, 64], strides = [1, 1]} : vector<8x128xf32> to vector<1x64xf32>
    %c1_84 = arith.constant 1 : index
    %c384_85 = arith.constant 384 : index
    %125 = vector.load %arg12[%c1_84, %c384_85] : memref<2x512xf32, #tpu.memory_space<vmem>>, vector<1x64xf32>
    tpu.vector_store %arg12[%c1_84, %c384_85], %124 {strides = array<i32>} : memref<2x512xf32, #tpu.memory_space<vmem>>, vector<1x64xf32>,
    %126 = vector.extract_strided_slice %94 {offsets = [7, 64], sizes = [1, 64], strides = [1, 1]} : vector<8x128xf32> to vector<1x64xf32>
    %c1_86 = arith.constant 1 : index
    %c448_87 = arith.constant 448 : index
    %127 = vector.load %arg12[%c1_86, %c448_87] : memref<2x512xf32, #tpu.memory_space<vmem>>, vector<1x64xf32>
    tpu.vector_store %arg12[%c1_86, %c448_87], %126 {strides = array<i32>} : memref<2x512xf32, #tpu.memory_space<vmem>>, vector<1x64xf32>,
    %c0_88 = arith.constant 0 : index
    %c0_89 = arith.constant 0 : index
    %128 = vector.load %arg12[%c0_88, %c0_89] : memref<2x512xf32, #tpu.memory_space<vmem>>, vector<2x512xf32>
    %c0_90 = arith.constant 0 : index
    %c0_91 = arith.constant 0 : index
    %129 = vector.load %arg5[%c0_90, %c0_91] : memref<512x16xf32, #tpu.memory_space<vmem>>, vector<512x16xf32>
    %cst_92 = arith.constant dense<0.000000e+00> : vector<2x16xf32>
    %130 = tpu.matmul %128, %129, %cst_92 {dimension_numbers = #tpu.dot_dimension_numbers<[1], [0], [0], [1], [0, 0, 1, 1], [], []>} : vector<2x512xf32>, vector<512x16xf32>, vector<2x16xf32> -> vector<2x16xf32>
    %c0_93 = arith.constant 0 : index
    %c0_94 = arith.constant 0 : index
    %131 = vector.load %arg6[%c0_93, %c0_94] : memref<1x16xf32, #tpu.memory_space<vmem>>, vector<1x16xf32>
    %132 = vector.broadcast %131 : vector<1x16xf32> to vector<2x16xf32>
    %133 = arith.addf %130, %132 : vector<2x16xf32>
    %c0_95 = arith.constant 0 : index
    %c0_96 = arith.constant 0 : index
    %c0_97 = arith.constant 0 : index
    %134 = vector.load %arg9[%c0_95, %c0_96, %c0_97] : memref<1x2x16xf32, #tpu.memory_space<vmem>>, vector<1x2x16xf32>
    %135 = vector.shape_cast %134 : vector<1x2x16xf32> to vector<2x16xf32>
    %136 = vector.shape_cast %133 : vector<2x16xf32> to vector<1x2x16xf32>
    tpu.vector_store %arg9[%c0_95, %c0_96, %c0_97], %136 {strides = array<i32>} : memref<1x2x16xf32, #tpu.memory_space<vmem>>, vector<1x2x16xf32>,
    return
  }
  func.func @transform_0(%arg0: i32) -> (i32, i32) {
    %c0_i32 = arith.constant 0 : i32
    %c0_i32_0 = arith.constant 0 : i32
    return %c0_i32, %arg0 : i32, i32
  }
  func.func @transform_1(%arg0: i32) -> (i32, i32) {
    %c0_i32 = arith.constant 0 : i32
    %c0_i32_0 = arith.constant 0 : i32
    %c0_i32_1 = arith.constant 0 : i32
    return %c0_i32, %c0_i32_0 : i32, i32
  }
  func.func @transform_2(%arg0: i32) -> (i32, i32) {
    %c0_i32 = arith.constant 0 : i32
    %c0_i32_0 = arith.constant 0 : i32
    %c0_i32_1 = arith.constant 0 : i32
    return %c0_i32, %c0_i32_0 : i32, i32
  }
  func.func @transform_3(%arg0: i32) -> (i32, i32) {
    %c0_i32 = arith.constant 0 : i32
    %c0_i32_0 = arith.constant 0 : i32
    %c0_i32_1 = arith.constant 0 : i32
    return %c0_i32, %c0_i32_0 : i32, i32
  }
  func.func @transform_4(%arg0: i32) -> (i32, i32) {
    %c0_i32 = arith.constant 0 : i32
    %c0_i32_0 = arith.constant 0 : i32
    %c0_i32_1 = arith.constant 0 : i32
    return %c0_i32, %c0_i32_0 : i32, i32
  }
  func.func @transform_5(%arg0: i32) -> (i32, i32) {
    %c0_i32 = arith.constant 0 : i32
    %c0_i32_0 = arith.constant 0 : i32
    %c0_i32_1 = arith.constant 0 : i32
    return %c0_i32, %c0_i32_0 : i32, i32
  }
  func.func @transform_6(%arg0: i32) -> (i32, i32) {
    %c0_i32 = arith.constant 0 : i32
    %c0_i32_0 = arith.constant 0 : i32
    return %c0_i32, %arg0 : i32, i32
  }
  func.func @transform_7(%arg0: i32) -> (i32, i32) {
    %c0_i32 = arith.constant 0 : i32
    %c0_i32_0 = arith.constant 0 : i32
    return %c0_i32, %arg0 : i32, i32
  }
  func.func @transform_8(%arg0: i32) -> (i32, i32, i32) {
    %c0_i32 = arith.constant 0 : i32
    %c0_i32_0 = arith.constant 0 : i32
    %c0_i32_1 = arith.constant 0 : i32
    return %arg0, %c0_i32, %c0_i32_0 : i32, i32, i32
  }
}

</mosaic_0001>

<bundles_post_ra>
// kernel: fused_stem_forward.1
= control target key start
LH: loop header
LB: loop body
LE: loop exit
PB: predicated region body
PF: predicated region fallthrough
CT: control target
= control target key end

     0   :  { %s2070_s0 = inlined_call_operand.vmem [shape: f32[4,512], index: 0, kind: input, shape index: {}]   ;;  %s2071_s1 = inlined_call_operand.vmem [shape: bf16[8,38], index: 1, kind: input, shape index: {}]   ;;  %s2072_s2 = inlined_call_operand.vmem [shape: f32[9,512], index: 2, kind: input, shape index: {}]   ;;  %s2073_s3 = inlined_call_operand.vmem [shape: f32[512,128], index: 3, kind: input, shape index: {}]   ;;  %s2074_s4 = inlined_call_operand.vmem [shape: f32[512,16], index: 4, kind: input, shape index: {}]   ;;  %s2075_s5 = inlined_call_operand.vmem [shape: f32[1,16], index: 5, kind: input, shape index: {}]   ;;  %s2076_s6 = inlined_call_operand.vmem [shape: f32[8,512], index: 6, kind: output, shape index: {0}]   ;;  %s2077_s7 = inlined_call_operand.vmem [shape: f32[8,128], index: 7, kind: output, shape index: {1}]   ;;  %s2078_s8 = inlined_call_operand.hbm [shape: f32[1,2,16], index: 8, kind: output, shape index: {2}]  }
   0x1   :  { %v1321_v0 = vld [vmem:[%s2070_s0] sm:$0xff]  ;;  %v1326_v1 = vld [vmem:[%s2070_s0 + $0x8] sm:$0xff] }
   0x2   :  { %31 = vst [vmem:[#allocation2 + $0x4] sm:$0xff] %v1321_v0 }
   0x3   :  { %14 = vsyncpa [#allocation6], 0  ;;  %32 = vst [vmem:[#allocation2 + $0xc] sm:$0xff] %v1326_v1  ;;  %s1261_s0 = smov 17   ;;  %s1262_s9 = smov 16   ;;  %vm127_vm1 = vcmask 130048  }
   0x4   :  { %s1263_s10 = smov 15   ;;  %v287_v28 = vld [vmem:[#allocation2 + $0x14] sm:$0xf]  ;;  %s1264_s11 = smov 1   ;;  %vm72_vm5 = vcmask 138240   ;;  %vm188_vm10 = vcmask 121856  }
   0x5   :  { %v348_v36 = vld [vmem:[#allocation2 + $0x14] sm:$0xf]  ;;  %s1265_s12 = smov 127   ;;  %s1266_s13 = smov 113   ;;  %vm243_vm13 = vcmask 7168  }
   0x6   :  { %v403_v42 = vld [vmem:[#allocation2 + $0x14] sm:$0xf]  ;;  %s1267_s14 = smov 112   ;;  %s1268_s15 = smov 111  }
   0x7   :  { %v464_v50 = vld [vmem:[#allocation2 + $0x14] sm:$0xf]  ;;  %s1271_s21 = smov 64   ;;  %s1072_s17 = sshll.u32 %s2078_s8, 4  ;;  %s1073_s17 = int_to_ptr.hbm [resolvable:$true] %s1072_s17 }
   0x9   :  { %v35_v4 = vld [vmem:[#allocation2] sm:$0xff] }
   0xa   :  { %v36_v2 = vld [vmem:[#allocation2 + $0x8] sm:$0xff]  ;;  %v37_v3 = vld [vmem:[#allocation2 + $0x10] sm:$0xf]  ;;  %52 = vst [vmem:[#allocation1] ss:$2 sm:$0xff] %v35_v4 }
   0xb   :  { %54 = vst [vmem:[#allocation1 + $0x10] ss:$2 sm:$0xff] %v36_v2  ;;  %v91_v5 = vld [vmem:[#allocation2 + $0x10] sm:$0xf] }
   0xc   :  { %56 = vst [vmem:[#allocation1 + $0x20] ss:$2 sm:$0xff] %v37_v3  ;;  %v152_v13 = vld [vmem:[#allocation2 + $0x10] sm:$0xf] }
   0xd   :  { %v207_v21 = vld [vmem:[#allocation2 + $0x10] sm:$0xf] }
  0x11   :  { %v57_v10 = vld.sshfl [vmem:[#allocation1] sm:$0xff pattern:$0x75316420]  ;;  %v1331_v12 = vld.sshfl [vmem:[#allocation1 + $0x8] sm:$0xff pattern:$0x75316420] }
  0x12   :  { %v59_v6 = vld.sshfl [vmem:[#allocation1 + $0x10] sm:$0xff pattern:$0x75316420]  ;;  %v60_v7 = vld.sshfl [vmem:[#allocation1 + $0x18] sm:$0xff pattern:$0x75316420] }
  0x13   :  { %v1154_v8 = vpack.i.bf16 %v60_v7, %v59_v6  ;;  %109 = vst [vmem:[#allocation1 + $0x10] ss:$2 sm:$0xff] %v36_v2  ;;  %v61_v9 = vld.sshfl [vmem:[#allocation1 + $0x20] sm:$0xff pattern:$0x75316420] }
  0x14   :  { %111 = vst [vmem:[#allocation1 + $0x20] ss:$2 sm:$0xff] %v91_v5  ;;  %v1159_v11 = vpack.i.bf16 %v57_v10, %v61_v9 }
  0x15   :  { %1155 = vrot.lane.b32.xlu1 %v1154_v8, %s1261_s0  ;;  %107 = vst [vmem:[#allocation1] ss:$2 sm:$0xff] %v35_v4 }
  0x16   :  { %1160 = vrot.lane.b32.xlu2 %v1159_v11, %s1261_s0  ;;  %v1085_v11 = vld [vmem:[%s2072_s2 + $0x1] ss:$8 sm:$0xf] }
  0x17   :  { %vm94_vm0 = vcmp.ne.f32.partialorder %v1085_v11, 0.0 }
  0x1a   :  { %v114_v14 = vld.sshfl [vmem:[#allocation1 + $0x10] sm:$0xff pattern:$0x75316420]  ;;  %v115_v15 = vld.sshfl [vmem:[#allocation1 + $0x18] sm:$0xff pattern:$0x75316420] }
  0x1b   :  { %170 = vst [vmem:[#allocation1 + $0x10] ss:$2 sm:$0xff] %v36_v2  ;;  %v116_v16 = vld.sshfl [vmem:[#allocation1 + $0x20] sm:$0xff pattern:$0x75316420]  ;;  %v1164_v17 = vpack.i.bf16 %v115_v15, %v114_v14  ;;  %v1269_v15 = vmov 0  }
  0x1c   :  { %172 = vst [vmem:[#allocation1 + $0x20] ss:$2 sm:$0xff] %v152_v13  ;;  %v112_v18 = vld.sshfl [vmem:[#allocation1] sm:$0xff pattern:$0x75316420] }
  0x1d   :  { %v1334_v19 = vld.sshfl [vmem:[#allocation1 + $0x8] sm:$0xff pattern:$0x75316420]  ;;  %v1169_v20 = vpack.i.bf16 %v112_v18, %v116_v16  ;;  %v1390_v16 = vsel %vm94_vm0, 1, %v1269_v15 }
  0x1e   :  { %168 = vst [vmem:[#allocation1] ss:$2 sm:$0xff] %v35_v4  ;;  %1165 = vrot.lane.b32.xlu2 %v1164_v17, %s1262_s9  ;;  %v1086_v14 = vld [vmem:[%s2072_s2 + $0x2] ss:$8 sm:$0xf]  ;;  %v98_v17 = vperm.slane %v1390_v16, 2 }
  0x1f   :  { %1170 = vrot.lane.b32.xlu0 %v1169_v20, %s1262_s9  ;;  %v99_v18 = vperm.slane %v1390_v16, 3  ;;  %vm155_vm3 = vcmp.ne.f32.partialorder %v1086_v14, 0.0  ;;  %v1088_v14 = vld [vmem:[%s2072_s2 + $0x5] ss:$8 sm:$0xf] }
  0x20   :  { %vm1400_vm4 = vcmp.eq.s32.totalorder %v98_v17, 1 }
  0x21   :  { %vm103_vm6 = vcmp.eq.s32.totalorder %v99_v18, 1 }
  0x22   :  { %v175_v22 = vld.sshfl [vmem:[#allocation1 + $0x10] sm:$0xff pattern:$0x75316420]  ;;  %v176_v23 = vld.sshfl [vmem:[#allocation1 + $0x18] sm:$0xff pattern:$0x75316420] }
  0x23   :  { %v177_v24 = vld.sshfl [vmem:[#allocation1 + $0x20] sm:$0xff pattern:$0x75316420]  ;;  %225 = vst [vmem:[#allocation1 + $0x10] ss:$2 sm:$0xff] %v36_v2  ;;  %v1174_v25 = vpack.i.bf16 %v176_v23, %v175_v22 }
  0x24   :  { %227 = vst [vmem:[#allocation1 + $0x20] ss:$2 sm:$0xff] %v207_v21  ;;  %186 = vrot.lane.b32.xlu1 %v177_v24, %s1263_s10 }
  0x25   :  { %v1339_v26 = vld.sshfl [vmem:[#allocation1] sm:$0xff pattern:$0x75316420]  ;;  %v1341_v27 = vld.sshfl [vmem:[#allocation1 + $0x8] sm:$0xff pattern:$0x75316420] }
  0x26   :  { %223 = vst [vmem:[#allocation1] ss:$2 sm:$0xff] %v35_v4 }
  0x27   :  { %1175 = vrot.lane.b32.xlu0 %v1174_v25, %s1263_s10 }
  0x2a   :  { %v230_v29 = vld.sshfl [vmem:[#allocation1 + $0x10] sm:$0xff pattern:$0x75316420]  ;;  %v231_v30 = vld.sshfl [vmem:[#allocation1 + $0x18] sm:$0xff pattern:$0x75316420] }
  0x2b   :  { %v1179_v31 = vpack.i.bf16 %v231_v30, %v230_v29  ;;  %272 = vst [vmem:[#allocation1 + $0x10] ss:$2 sm:$0xff] %v1326_v1  ;;  %v232_v32 = vld.sshfl [vmem:[#allocation1 + $0x20] sm:$0xff pattern:$0x75316420]  ;;  %v1419_v30 = vsel %vm155_vm3, 1, %v1269_v15 }
  0x2c   :  { %307 = vst [vmem:[#allocation1 + $0x20] ss:$2 sm:$0xff] %v287_v28  ;;  %v1087_v29 = vld [vmem:[%s2072_s2 + $0x3] ss:$8 sm:$0xf]  ;;  %vm439_vm3 = vcmask 916480  }
  0x2d   :  { %1180 = vrot.lane.b32.xlu1 %v1179_v31, %s1264_s11  ;;  %v228_v33 = vld.sshfl [vmem:[#allocation1] sm:$0xff pattern:$0x75316420]  ;;  %v1346_v34 = vld.sshfl [vmem:[#allocation1 + $0x8] sm:$0xff pattern:$0x75316420] }
  0x2e   :  { %v1184_v35 = vpack.i.bf16 %v228_v33, %v232_v32  ;;  %270 = vst [vmem:[#allocation1] ss:$2 sm:$0xff] %v1321_v0  ;;  %vm210_vm8 = vcmp.ne.f32.partialorder %v1087_v29, 0.0 }
  0x30   :  { %1185 = vrot.lane.b32.xlu2 %v1184_v35, %s1264_s11 }
  0x32   :  { %v1350_v37 = vld.sshfl [vmem:[#allocation1 + $0x10] sm:$0xff pattern:$0x75316420]  ;;  %v1352_v38 = vld.sshfl [vmem:[#allocation1 + $0x18] sm:$0xff pattern:$0x75316420] }
  0x33   :  { %305 = vst [vmem:[#allocation1 + $0x10] ss:$2 sm:$0xff] %v1326_v1  ;;  %v312_v39 = vld.sshfl [vmem:[#allocation1 + $0x20] sm:$0xff pattern:$0x75316420] }
  0x34   :  { %368 = vst [vmem:[#allocation1 + $0x20] ss:$2 sm:$0xff] %v348_v36 }
  0x35   :  { %v1355_v40 = vld.sshfl [vmem:[#allocation1] sm:$0xff pattern:$0x75316420]  ;;  %v1357_v41 = vld.sshfl [vmem:[#allocation1 + $0x8] sm:$0xff pattern:$0x75316420] }
  0x36   :  { %303 = vst [vmem:[#allocation1] ss:$2 sm:$0xff] %v1321_v0 }
  0x3a   :  { %v310_v43 = vld.sshfl [vmem:[#allocation1 + $0x10] sm:$0xff pattern:$0x75316420]  ;;  %v311_v44 = vld.sshfl [vmem:[#allocation1 + $0x18] sm:$0xff pattern:$0x75316420] }
  0x3b   :  { %v1189_v45 = vpack.i.bf16 %v311_v44, %v310_v43  ;;  %366 = vst [vmem:[#allocation1 + $0x10] ss:$2 sm:$0xff] %v1326_v1  ;;  %v373_v46 = vld.sshfl [vmem:[#allocation1 + $0x20] sm:$0xff pattern:$0x75316420]  ;;  %v159_v43 = vperm.slane %v1419_v30, 2 }
  0x3c   :  { %423 = vst [vmem:[#allocation1 + $0x20] ss:$2 sm:$0xff] %v403_v42  ;;  %v160_v44 = vperm.slane %v1419_v30, 3 }
  0x3d   :  { %1190 = vrot.lane.b32.xlu1 %v1189_v45, %s1265_s12  ;;  %v309_v47 = vld.sshfl [vmem:[#allocation1 + $0x8] sm:$0xff pattern:$0x75316420]  ;;  %v308_v48 = vld.sshfl [vmem:[#allocation1] sm:$0xff pattern:$0x75316420] }
  0x3e   :  { %315 = vrot.lane.b32.xlu2 %v309_v47, %s1265_s12  ;;  %364 = vst [vmem:[#allocation1] ss:$2 sm:$0xff] %v1321_v0  ;;  %v1194_v49 = vpack.i.bf16 %v308_v48, %v312_v39  ;;  %vm163_vm11 = vcmp.eq.s32.totalorder %v159_v43, 1  ;;  %vm164_vm12 = vcmp.eq.s32.totalorder %v160_v44, 1  ;;  %v96_v43 = vperm.slane %v1390_v16, 0 }
  0x3f   :  { %v97_v44 = vperm.slane %v1390_v16, 1 }
  0x42   :  { %v371_v51 = vld.sshfl [vmem:[#allocation1 + $0x10] sm:$0xff pattern:$0x75316420]  ;;  %v372_v52 = vld.sshfl [vmem:[#allocation1 + $0x18] sm:$0xff pattern:$0x75316420] }
  0x43   :  { %v1199_v53 = vpack.i.bf16 %v372_v52, %v371_v51  ;;  %421 = vst [vmem:[#allocation1 + $0x10] ss:$2 sm:$0xff] %v1326_v1  ;;  %v428_v54 = vld.sshfl [vmem:[#allocation1 + $0x20] sm:$0xff pattern:$0x75316420]  ;;  %v1435_v51 = vsel %vm210_vm8, 1, %v1269_v15 }
  0x44   :  { %484 = vst [vmem:[#allocation1 + $0x20] ss:$2 sm:$0xff] %v464_v50  ;;  %vm323_vm8 = vcmask 1039360  }
  0x45   :  { %1195 = vrot.lane.b32.xlu1 %v1194_v49, %s1265_s12  ;;  %1200 = vrot.lane.b32.xlu0 %v1199_v53, %s1266_s13  ;;  %v369_v55 = vld.sshfl [vmem:[#allocation1] sm:$0xff pattern:$0x75316420]  ;;  %v370_v56 = vld.sshfl [vmem:[#allocation1 + $0x8] sm:$0xff pattern:$0x75316420] }
  0x46   :  { %419 = vst [vmem:[#allocation1] ss:$2 sm:$0xff] %v1321_v0  ;;  %v1204_v57 = vpack.i.bf16 %v369_v55, %v373_v46 }
  0x4a   :  { %v426_v58 = vld.sshfl [vmem:[#allocation1 + $0x10] sm:$0xff pattern:$0x75316420]  ;;  %v427_v59 = vld.sshfl [vmem:[#allocation1 + $0x18] sm:$0xff pattern:$0x75316420] }
  0x4b   :  { %v1209_v60 = vpack.i.bf16 %v427_v59, %v426_v58  ;;  %482 = vst [vmem:[#allocation1 + $0x10] ss:$2 sm:$0xff] %v1326_v1  ;;  %v489_v6 = vld.sshfl [vmem:[#allocation1 + $0x20] sm:$0xff pattern:$0x75316420] }
  0x4d   :  { %1210 = vrot.lane.b32.xlu2 %v1209_v60, %s1267_s14  ;;  %1205 = vrot.lane.b32.xlu1 %v1204_v57, %s1266_s13  ;;  %v424_v61 = vld.sshfl [vmem:[#allocation1] sm:$0xff pattern:$0x75316420]  ;;  %v425_v62 = vld.sshfl [vmem:[#allocation1 + $0x8] sm:$0xff pattern:$0x75316420] }
  0x4e   :  { %480 = vst [vmem:[#allocation1] ss:$2 sm:$0xff] %v1321_v0  ;;  %v1214_v3 = vpack.i.bf16 %v424_v61, %v428_v54  ;;  %v1229_v0 = vpack.i.bf16 %v1341_v27, %v1339_v26  ;;  %v214_v57 = vperm.slane %v1435_v51, 2  ;;  %v215_v60 = vperm.slane %v1435_v51, 3 }
  0x50   :  { %vm218_vm14 = vcmp.eq.s32.totalorder %v214_v57, 1  ;;  %vm219_vm15 = vcmp.eq.s32.totalorder %v215_v60, 1 }
  0x52   :  { %v487_v63 = vld.sshfl [vmem:[#allocation1 + $0x10] sm:$0xff pattern:$0x75316420]  ;;  %v488_v2 = vld.sshfl [vmem:[#allocation1 + $0x18] sm:$0xff pattern:$0x75316420] }
  0x53   :  { %v1219_v4 = vpack.i.bf16 %v488_v2, %v487_v63 }
  0x55   :  { %1220 = vrot.lane.b32.xlu0 %v1219_v4, %s1268_s15  ;;  %376 = vrot.lane.b32.xlu1 %v370_v56, %s1266_s13  ;;  %v485_v5 = vld.sshfl [vmem:[#allocation1] sm:$0xff pattern:$0x75316420]  ;;  %v486_v1 = vld.sshfl [vmem:[#allocation1 + $0x8] sm:$0xff pattern:$0x75316420] }
  0x56   :  { %1215 = vrot.lane.b32.xlu2 %v1214_v3, %s1267_s14  ;;  %v1224_v7 = vpack.i.bf16 %v485_v5, %v489_v6  ;;  %v1090_v4 = vld [vmem:[%s2072_s2 + $0x7] ss:$8 sm:$0xf]  ;;  %s1272_s13 = smov [#allocation5]  }
  0x57   :  { %vm406_vm0 = vcmp.ne.f32.partialorder %v1090_v4, 0.0  ;;  %v1270_v4 = vmov 1065369472  }
  0x58   :  { %v1467_v17 = vsel %vm406_vm0, 1, %v1269_v15  ;;  %vm1521_vm0 = vcmp.eq.s32.totalorder %v97_v44, 1  ;;  %34 = vst [vmem:[#allocation3 + $0x48] sm:$0x44] %v1270_v4 }
  0x59   :  { %v411_v23 = vperm.slane %v1467_v17, 3  ;;  %33 = vst [vmem:[#allocation3 + $0x40] sm:$0x44] %v1270_v4 }
  0x5d   :  { %64 = vrot.lane.b32.xlu1 %v1331_v12, %s1261_s0  ;;  %1225 = vrot.lane.b32.xlu0 %v1224_v7, %s1268_s15 }
  0x5e   :  { %119 = vrot.lane.b32.xlu2 %v1334_v19, %s1262_s9  ;;  %v38_v19 = vld [vmem:[%s2072_s2] ss:$8 sm:$0xf] }
  0x5f   :  { %vm39_vm2 = vcmp.ne.f32.partialorder %v38_v19, 0.0 }
  0x60   :  { %v1410_v26 = vsel %vm39_vm2, 1, %v1269_v15  ;;  %vm290_vm2 = vcmp.ne.f32.partialorder %v1088_v14, 0.0 }
  0x61   :  { %v43_v32 = vperm.slane %v1410_v26, 2 }
  0x63   :  { %vm47_vm7 = vcmp.eq.s32.totalorder %v43_v32, 1 }
  0x65   :  { %492 = vrot.lane.b32.xlu0 %v486_v1, %s1268_s15  ;;  %v282_v1 = vpack.c.bf16 %v1352_v38, %v1350_v37  ;;  %v410_v37 = vperm.slane %v1467_v17, 2  ;;  %v291_v38 = vsel %vm290_vm2, 1, %v1269_v15 }
  0x66   :  { %1230 = vrot.lane.b32.xlu2 %v1229_v0, %s1263_s10  ;;  %v293_v32 = vperm.slane %v291_v38, 1 }
  0x67   :  { %284 = vst [vmem:[#allocation3 + $0x28] sm:$0x33] %v282_v1 }
  0x6d   :  { %431 = vrot.lane.b32.xlu0 %v425_v62, %s1267_s14  ;;  %s1070_s14 = sshll.u32 %s1272_s13, 4  ;;  %s1071_s14 = int_to_ptr.vmem [resolvable:$true] %s1070_s14 }
  0x70   :  { %v1375_v8 = vpop.permute.xlu2 %1160 }
  0x71   :  { %v1162_v20 = vunpack.i.l.bf16 %v1375_v8 }
  0x75   :  { %235 = vrot.lane.b32.xlu0 %v1346_v34, %s1264_s11  ;;  %v44_v34 = vperm.slane %v1410_v26, 3 }
  0x77   :  { %vm48_vm9 = vcmp.eq.s32.totalorder %v44_v34, 1 }
  0x78   :  { %v1377_v9 = vpop.permute.xlu2 %1165 }
  0x79   :  { %v1168_v12 = vunpack.i.h.bf16 %v1377_v9  ;;  %v1167_v13 = vunpack.i.l.bf16 %v1377_v9 }
  0x7b   :  { %v130_v25 = vsel %vm127_vm1, %v1167_v13, %v1168_v12 }
  0x7c   :  { %v138_v31 = vsel %vm1400_vm4, %v130_v25, 0.0  ;;  %v281_v25 = vpack.c.bf16 %v1357_v41, %v1355_v40  ;;  %vm1479_vm4 = vcmp.eq.s32.totalorder %v410_v37, 1  ;;  %v292_v40 = vperm.slane %v291_v38, 0 }
  0x7d   :  { %v295_v41 = vperm.slane %v291_v38, 3 }
  0x7e   :  { %283 = vst [vmem:[#allocation3 + $0x20] sm:$0x33] %v281_v25 }
  0x87   :  { %v1379_v10 = vpop.permute.xlu1 %1155 }
  0x88   :  { %v1158_v21 = vunpack.i.h.bf16 %v1379_v10  ;;  %v1157_v22 = vunpack.i.l.bf16 %v1379_v10 }
  0x8a   :  { %v1412_v27 = vpop.permute.xlu2 %1185  ;;  %v75_v35 = vsel %vm72_vm5, %v1157_v22, %v1158_v21  ;;  %v76_v36 = vsel %vm72_vm5, %v1158_v21, %v1162_v20  ;;  %v1089_v21 = vld [vmem:[%s2072_s2 + $0x6] ss:$8 sm:$0xf] }
  0x8b   :  { %v83_v46 = vsel %vm47_vm7, %v75_v35, 0.0  ;;  %v84_v47 = vsel %vm48_vm9, %v76_v36, 0.0  ;;  %v1187_v63 = vunpack.i.l.bf16 %v1412_v27  ;;  %vm415_vm7 = vcmp.eq.s32.totalorder %v411_v23, 1 }
  0x8c   :  { %v86_v49 = vpack.c.bf16 %v84_v47, %v83_v46  ;;  %vm1494_vm9 = vcmp.eq.s32.totalorder %v293_v32, 1 }
  0x8e   :  { %88 = vst [vmem:[#allocation3 + $0x8] sm:$0x33] %v86_v49 }
  0x91   :  { %v1404_v24 = vpop.permute.xlu0 %1170 }
  0x92   :  { %v1172_v28 = vunpack.i.l.bf16 %v1404_v24 }
  0x94   :  { %v131_v33 = vsel %vm127_vm1, %v1168_v12, %v1172_v28 }
  0x95   :  { %v139_v42 = vsel %vm103_vm6, %v131_v33, 0.0  ;;  %v294_v33 = vperm.slane %v291_v38, 2  ;;  %vm351_vm6 = vcmp.ne.f32.partialorder %v1089_v21, 0.0 }
  0x96   :  { %v187_v39 = vpop.permute.xlu1 %186  ;;  %v141_v45 = vpack.c.bf16 %v139_v42, %v138_v31  ;;  %v1499_v47 = vsel %vm351_vm6, 1, %v1269_v15 }
  0x97   :  { %v353_v49 = vperm.slane %v1499_v47, 0 }
  0x98   :  { %v145_v48 = vrot.slane %v141_v45, 6  ;;  %v1439_v54 = vpop.permute.xlu2 %315 }
  0x99   :  { %v1432_v50 = vpop.permute.xlu0 %1175 }
  0x9a   :  { %v1178_v52 = vunpack.i.h.bf16 %v1432_v50  ;;  %v1177_v53 = vunpack.i.l.bf16 %v1432_v50  ;;  %149 = vst [vmem:[#allocation3 + $0x8] sm:$0xcc] %v145_v48 }
  0x9c   :  { %v192_v55 = vsel %vm188_vm10, %v1178_v52, %v187_v39  ;;  %v191_v56 = vsel %vm188_vm10, %v1177_v53, %v1178_v52 }
  0x9d   :  { %v200_v58 = vsel %vm164_vm12, %v192_v55, 0.0  ;;  %v199_v59 = vsel %vm163_vm11, %v191_v56, 0.0  ;;  %vm1501_vm11 = vcmp.eq.s32.totalorder %v294_v33, 1  ;;  %v1173_v56 = vunpack.i.h.bf16 %v1404_v24 }
  0x9e   :  { %v202_v62 = vpack.c.bf16 %v200_v58, %v199_v59  ;;  %vm1509_vm12 = vcmp.eq.s32.totalorder %v292_v40, 1  ;;  %v355_v24 = vperm.slane %v1499_v47, 2  ;;  %v158_v33 = vperm.slane %v1419_v30, 1 }
  0x9f   :  { %v1447_v61 = vpop.permute.xlu1 %1180 }
  0xa0   :  { %v1183_v2 = vunpack.i.h.bf16 %v1447_v61  ;;  %v1182_v3 = vunpack.i.l.bf16 %v1447_v61  ;;  %204 = vst [vmem:[#allocation3 + $0x18] sm:$0x33] %v202_v62  ;;  %vm1552_vm2 = vcmp.eq.s32.totalorder %v355_v24, 1  ;;  %v702_v61 = vld [vmem:[%s2073_s3 + $0x178] sm:$0xff] }
  0xa2   :  { %v246_v5 = vsel %vm243_vm13, %v1182_v3, %v1183_v2  ;;  %v247_v6 = vsel %vm243_vm13, %v1183_v2, %v1187_v63 }
  0xa3   :  { %v254_v7 = vsel %vm218_vm14, %v246_v5, 0.0  ;;  %v255_v0 = vsel %vm219_vm15, %v247_v6, 0.0  ;;  %vm1513_vm14 = vcmp.eq.s32.totalorder %v295_v41, 1  ;;  %vm1517_vm15 = vcmp.eq.s32.totalorder %v96_v43, 1 }
  0xa4   :  { %v257_v11 = vpack.c.bf16 %v255_v0, %v254_v7  ;;  %v409_v43 = vperm.slane %v1467_v17, 1 }
  0xa6   :  { %v261_v18 = vrot.slane %v257_v11, 6 }
  0xa7   :  { %v1461_v12 = vpop.permute.xlu2 %1210 }
  0xa8   :  { %265 = vst [vmem:[#allocation3 + $0x18] sm:$0xcc] %v261_v18  ;;  %v1213_v19 = vunpack.i.h.bf16 %v1461_v12  ;;  %v1212_v20 = vunpack.i.l.bf16 %v1461_v12 }
  0xaa   :  { %v442_v31 = vsel %vm439_vm3, %v1212_v20, %v1213_v19 }
  0xab   :  { %v450_v42 = vsel %vm1479_vm4, %v442_v31, 0.0  ;;  %v356_v31 = vperm.slane %v1499_v47, 3 }
  0xad   :  { %vm1561_vm6 = vcmp.eq.s32.totalorder %v356_v31, 1 }
  0xaf   :  { %v1191_v28 = vpop.permute.xlu1 %1190 }
  0xb0   :  { %v1486_v34 = vpop.permute.xlu2 %1215  ;;  %v1193_v35 = vunpack.i.h.bf16 %v1191_v28  ;;  %v1192_v36 = vunpack.i.l.bf16 %v1191_v28 }
  0xb1   :  { %v1217_v39 = vunpack.i.l.bf16 %v1486_v34 }
  0xb2   :  { %v325_v52 = vsel %vm323_vm8, %v1439_v54, %v1192_v36  ;;  %v326_v55 = vsel %vm323_vm8, %v1192_v36, %v1193_v35 }
  0xb3   :  { %v443_v45 = vsel %vm439_vm3, %v1213_v19, %v1217_v39  ;;  %v333_v5 = vsel %vm1494_vm9, %v325_v52, 0.0  ;;  %v334_v6 = vsel %vm1501_vm11, %v326_v55, 0.0  ;;  %v354_v52 = vperm.slane %v1499_v47, 1 }
  0xb4   :  { %v451_v48 = vsel %vm415_vm7, %v443_v45, 0.0  ;;  %vm162_vm7 = vcmp.eq.s32.totalorder %v158_v33, 1  ;;  %vm357_vm9 = vcmp.eq.s32.totalorder %v353_v49, 1 }
  0xb5   :  { %v453_v16 = vpack.c.bf16 %v451_v48, %v450_v42  ;;  %vm358_vm11 = vcmp.eq.s32.totalorder %v354_v52, 1  ;;  %v212_v52 = vperm.slane %v1435_v51, 0 }
  0xb7   :  { %v1196_v59 = vpop.permute.xlu1 %1195  ;;  %v1525_v63 = vpop.permute.xlu0 %1200  ;;  %v457_v2 = vrot.slane %v453_v16, 6  ;;  %v1091_v16 = vld [vmem:[%s2072_s2 + $0x20] ss:$8 sm:$0xf] }
  0xb8   :  { %v1198_v7 = vunpack.i.h.bf16 %v1196_v59  ;;  %v1197_v0 = vunpack.i.l.bf16 %v1196_v59  ;;  %v120_v1 = vpop.permute.xlu2 %119  ;;  %v1203_v18 = vunpack.i.h.bf16 %v1525_v63  ;;  %v1202_v19 = vunpack.i.l.bf16 %v1525_v63 }
  0xb9   :  { %v128_v11 = vsel %vm127_vm1, %v1173_v56, %v120_v1  ;;  %v129_v14 = vsel %vm127_vm1, %v120_v1, %v1167_v13  ;;  %461 = vst [vmem:[#allocation3 + $0x38] sm:$0xcc] %v457_v2  ;;  %vm384_vm1 = vcmask 924672   ;;  %v42_v1 = vperm.slane %v1410_v26, 1 }
  0xba   :  { %v324_v37 = vsel %vm323_vm8, %v1198_v7, %v1439_v54  ;;  %v327_v38 = vsel %vm323_vm8, %v1193_v35, %v1197_v0  ;;  %v136_v21 = vsel %vm1517_vm15, %v128_v11, 0.0  ;;  %v137_v23 = vsel %vm1521_vm0, %v129_v14, 0.0 }
  0xbb   :  { %v332_v9 = vsel %vm1509_vm12, %v324_v37, 0.0  ;;  %v335_v13 = vsel %vm1513_vm14, %v327_v38, 0.0  ;;  %v140_v25 = vpack.c.bf16 %v137_v23, %v136_v21  ;;  %v157_v54 = vperm.slane %v1419_v30, 0 }
  0xbc   :  { %v336_v28 = vpack.c.bf16 %v333_v5, %v332_v9  ;;  %v337_v29 = vpack.c.bf16 %v335_v13, %v334_v6  ;;  %v387_v40 = vsel %vm384_vm1, %v1202_v19, %v1203_v18  ;;  %vm467_vm8 = vcmp.ne.f32.partialorder %v1091_v16, 0.0 }
  0xbd   :  { %v144_v32 = vrot.slane %v140_v25, 6  ;;  %vm1557_vm4 = vcmp.eq.s32.totalorder %v157_v54, 1  ;;  %v395_v48 = vsel %vm1552_vm2, %v387_v40, 0.0  ;;  %v468_v4 = vsel %vm467_vm8, 1, %v1269_v15 }
  0xbe   :  { %v340_v35 = vrot.slane %v336_v28, 6  ;;  %v341_v36 = vrot.slane %v337_v29, 6  ;;  %v41_v0 = vperm.slane %v1410_v26, 0  ;;  %v471_v11 = vperm.slane %v468_v4, 2 }
  0xbf   :  { %148 = vst [vmem:[#allocation3] sm:$0xcc] %v144_v32  ;;  %v1206_v41 = vpop.permute.xlu1 %1205  ;;  %v472_v14 = vperm.slane %v468_v4, 3  ;;  %v1163_v38 = vunpack.i.h.bf16 %v1375_v8  ;;  %vm46_vm14 = vcmp.eq.s32.totalorder %v42_v1, 1  ;;  %v469_v29 = vperm.slane %v468_v4, 0  ;;  %v707_v1 = vld [vmem:[%s2073_s3 + $0x1a0] sm:$0xff] }
  0xc0   :  { %344 = vst [vmem:[#allocation3 + $0x20] sm:$0xcc] %v340_v35  ;;  %v1207_v42 = vunpack.i.l.bf16 %v1206_v41  ;;  %v1231_v44 = vpop.permute.xlu2 %1230  ;;  %v1208_v59 = vunpack.i.h.bf16 %v1206_v41  ;;  %vm45_vm12 = vcmp.eq.s32.totalorder %v41_v0, 1  ;;  %vm475_vm15 = vcmp.eq.s32.totalorder %v471_v11, 1  ;;  %v1135_v0 = vld [vmem:[#allocation3 + $0xc] sm:$0xf] }
  0xc1   :  { %345 = vst [vmem:[#allocation3 + $0x28] sm:$0xcc] %v341_v36  ;;  %v1233_v30 = vunpack.i.h.bf16 %v1231_v44  ;;  %v1232_v46 = vunpack.i.l.bf16 %v1231_v44  ;;  %vm476_vm0 = vcmp.eq.s32.totalorder %v472_v14, 1  ;;  %v470_v8 = vperm.slane %v468_v4, 1  ;;  %v664_v11 = vld [vmem:[%s2073_s3 + $0x48] sm:$0xff] }
  0xc2   :  { %v388_v55 = vsel %vm384_vm1, %v1203_v18, %v1207_v42  ;;  %v408_v42 = vperm.slane %v1467_v17, 0  ;;  %v1218_v44 = vunpack.i.h.bf16 %v1486_v34  ;;  %vm800_vm8 = vcmask 516096  }
  0xc3   :  { %v190_v56 = vsel %vm188_vm10, %v1233_v30, %v1177_v53  ;;  %v189_v57 = vsel %vm188_vm10, %v1232_v46, %v1233_v30  ;;  %v396_v58 = vsel %vm1561_vm6, %v388_v55, 0.0  ;;  %vm500_vm10 = vcmask 908288   ;;  %v713_v30 = vld [vmem:[%s2073_s3 + $0x1d0] sm:$0xff] }
  0xc4   :  { %v198_v60 = vsel %vm162_vm7, %v190_v56, 0.0  ;;  %v197_v47 = vsel %vm1557_vm4, %v189_v57, 0.0  ;;  %v398_v62 = vpack.c.bf16 %v396_v58, %v395_v48  ;;  %vm474_vm2 = vcmp.eq.s32.totalorder %v470_v8, 1 }
  0xc5   :  { %v201_v63 = vpack.c.bf16 %v198_v60, %v197_v47  ;;  %vm413_vm4 = vcmp.eq.s32.totalorder %v409_v43, 1  ;;  %vm582_vm6 = vcmask 1042432   ;;  %v213_v55 = vperm.slane %v1435_v51, 1  ;;  %v714_v43 = vld [vmem:[%s2073_s3 + $0x1d8] sm:$0xff] }
  0xc6   :  { %400 = vst [vmem:[#allocation3 + $0x38] sm:$0x33] %v398_v62 }
  0xc7   :  { %203 = vst [vmem:[#allocation3 + $0x10] sm:$0x33] %v201_v63  ;;  %v1221_v50 = vpop.permute.xlu0 %1220  ;;  %v377_v24 = vpop.permute.xlu1 %376  ;;  %vm1617_vm7 = vcmp.eq.s32.totalorder %v213_v55, 1  ;;  %v1110_v8 = vld [vmem:[#allocation3 + $0x20] sm:$0xf] }
  0xc8   :  { %v385_v53 = vsel %vm384_vm1, %v1208_v59, %v377_v24  ;;  %v386_v2 = vsel %vm384_vm1, %v377_v24, %v1202_v19  ;;  %v1223_v18 = vunpack.i.h.bf16 %v1221_v50  ;;  %v1222_v37 = vunpack.i.l.bf16 %v1221_v50  ;;  %v1118_v59 = vld [vmem:[#allocation3 + $0x28] sm:$0xf]  ;;  %v1139_v60 = vld [vmem:[#allocation3 + $0x2c] sm:$0xf] }
  0xc9   :  { %v393_v5 = vsel %vm357_vm9, %v385_v53, 0.0  ;;  %v394_v6 = vsel %vm358_vm11, %v386_v2, 0.0  ;;  %vm473_vm1 = vcmp.eq.s32.totalorder %v469_v29, 1  ;;  %v1188_v2 = vunpack.i.h.bf16 %v1412_v27 }
  0xca   :  { %v397_v7 = vpack.c.bf16 %v394_v6, %v393_v5  ;;  %v503_v9 = vsel %vm500_vm10, %v1222_v37, %v1223_v18  ;;  %v1102_v6 = vld [vmem:[#allocation3 + $0x8] sm:$0xf]  ;;  %vm808_vm9 = vcmask 1040896   ;;  %vm1059_vm11 = vcmask 123904  }
  0xcb   :  { %v511_v31 = vsel %vm475_vm15, %v503_v9, 0.0 }
  0xcc   :  { %399 = vst [vmem:[#allocation3 + $0x30] sm:$0x33] %v397_v7  ;;  %v1137_v7 = vld [vmem:[#allocation3 + $0x14] sm:$0xf0] }
  0xcd   :  { %v1141_v51 = vld [vmem:[#allocation3 + $0x34] sm:$0xf0]  ;;  %v1120_v50 = vld [vmem:[#allocation3 + $0x38] sm:$0xf0]  ;;  %v1103_v9 = vor.u32 %v1137_v7, %v1102_v6  ;;  %v665_v6 = vld [vmem:[%s2073_s3 + $0x50] sm:$0xff] }
  0xce   :  { %v1119_v4 = vor.u32 %v1141_v51, %v1118_v59  ;;  %v1123_v5 = vor.u32 %v1139_v60, %v1120_v50  ;;  %v695_v59 = vld [vmem:[%s2073_s3 + $0x140] sm:$0xff]  ;;  %v710_v51 = vld [vmem:[%s2073_s3 + $0x1b8] sm:$0xff]  ;;  %v681_v7 = vld [vmem:[%s2073_s3 + $0xd0] sm:$0xff] }
  0xcf   :  { %v65_v19 = vpop.permute.xlu1 %64  ;;  %v1226_v21 = vpop.permute.xlu0 %1225  ;;  %v711_v60 = vld [vmem:[%s2073_s3 + $0x1c0] sm:$0xff] }
  0xd0   :  { %v73_v15 = vsel %vm72_vm5, %v1163_v38, %v65_v19  ;;  %v74_v26 = vsel %vm72_vm5, %v65_v19, %v1157_v22  ;;  %v1227_v23 = vunpack.i.l.bf16 %v1226_v21  ;;  %v1228_v35 = vunpack.i.h.bf16 %v1226_v21  ;;  %v667_v50 = vld [vmem:[%s2073_s3 + $0x60] sm:$0xff] }
  0xd1   :  { %v81_v13 = vsel %vm45_vm12, %v73_v15, 0.0  ;;  %v82_v25 = vsel %vm46_vm14, %v74_v26, 0.0  ;;  %vm1598_vm5 = vcmp.eq.s32.totalorder %v408_v42, 1  ;;  %v698_v42 = vld [vmem:[%s2073_s3 + $0x158] sm:$0xff] }
  0xd2   :  { %v85_v28 = vpack.c.bf16 %v82_v25, %v81_v13  ;;  %v504_v54 = vsel %vm500_vm10, %v1223_v18, %v1227_v23 }
  0xd3   :  { %v512_v32 = vsel %vm476_vm0, %v504_v54, 0.0  ;;  %v701_v54 = vld [vmem:[%s2073_s3 + $0x170] sm:$0xff] }
  0xd4   :  { %87 = vst [vmem:[#allocation3] sm:$0x33] %v85_v28  ;;  %v514_v33 = vpack.c.bf16 %v512_v32, %v511_v31  ;;  %v517_v28 = vld [vmem:[%s2071_s1] sm:$0xf]  ;;  %v717_v31 = vld [vmem:[%s2073_s3 + $0x1f0] sm:$0xff] }
  0xd6   :  { %516 = vst [vmem:[#allocation3 + $0x48] sm:$0x33] %v514_v33  ;;  %v1138_v33 = vld [vmem:[#allocation3 + $0x24] sm:$0xf] }
  0xd7   :  { %v493_v10 = vpop.permute.xlu0 %492 }
  0xd8   :  { %v501_v22 = vsel %vm500_vm10, %v1228_v35, %v493_v10  ;;  %v502_v36 = vsel %vm500_vm10, %v493_v10, %v1222_v37  ;;  %v1104_v37 = vld [vmem:[#allocation3 + $0x18] sm:$0xf0] }
  0xd9   :  { %v509_v39 = vsel %vm473_vm1, %v501_v22, 0.0  ;;  %v510_v40 = vsel %vm474_vm2, %v502_v36, 0.0  ;;  %v1107_v13 = vor.u32 %v1135_v0, %v1104_v37  ;;  %v700_v36 = vld [vmem:[%s2073_s3 + $0x168] sm:$0xff]  ;;  %v691_v0 = vld [vmem:[%s2073_s3 + $0x120] sm:$0xff] }
  0xda   :  { %v513_v41 = vpack.c.bf16 %v510_v40, %v509_v39  ;;  %v716_v39 = vld [vmem:[%s2073_s3 + $0x1e8] sm:$0xff]  ;;  %v699_v40 = vld [vmem:[%s2073_s3 + $0x160] sm:$0xff] }
  0xdb   :  { %v663_v37 = vld [vmem:[%s2073_s3 + $0x40] sm:$0xff] }
  0xdc   :  { %515 = vst [vmem:[#allocation3 + $0x40] sm:$0x33] %v513_v41  ;;  %v715_v41 = vld [vmem:[%s2073_s3 + $0x1e0] sm:$0xff] }
  0xdd   :  { %v527_v45 = vld [vmem:[#allocation3 + $0x48] sm:$0x77] }
  0xde   :  { %v556_v46 = vunpack.c.l.b16 %v527_v45  ;;  %v557_v48 = vunpack.c.h.b16 %v527_v45  ;;  %v697_v45 = vld [vmem:[%s2073_s3 + $0x150] sm:$0xff] }
  0xdf   :  { %v432_v49 = vpop.permute.xlu0 %431 }
  0xe0   :  { %v440_v16 = vsel %vm439_vm3, %v1218_v44, %v432_v49  ;;  %v441_v17 = vsel %vm439_vm3, %v432_v49, %v1212_v20  ;;  %v568_v34 = vpack.c.b16 %v556_v46, %v556_v46  ;;  %v569_v56 = vpack.c.b16 %v557_v48, %v557_v48  ;;  %v1094_v44 = vld [vmem:[#allocation3] sm:$0xf]  ;;  %v1134_v48 = vld [vmem:[#allocation3 + $0x4] sm:$0xf] }
  0xe1   :  { %v448_v57 = vsel %vm1598_vm5, %v440_v16, 0.0  ;;  %v449_v58 = vsel %vm413_vm4, %v441_v17, 0.0  ;;  %vm1613_vm3 = vcmp.eq.s32.totalorder %v212_v52, 1  ;;  %v670_v16 = vld [vmem:[%s2073_s3 + $0x78] sm:$0xff] }
  0xe2   :  { %v452_v47 = vpack.c.bf16 %v449_v58, %v448_v57  ;;  %v590_v62 = vsel %vm582_vm6, %v568_v34, 0  ;;  %v593_v63 = vsel %vm582_vm6, %v569_v56, 0  ;;  %v686_v17 = vld [vmem:[%s2073_s3 + $0xf8] sm:$0xff]  ;;  %v696_v34 = vld [vmem:[%s2073_s3 + $0x148] sm:$0xff]  ;;  %v669_v57 = vld [vmem:[%s2073_s3 + $0x70] sm:$0xff] }
  0xe3   :  { %626 = vmatpush.bf16.msra.mxu2 %v590_v62  ;;  %639 = vmatpush.bf16.msra.mxu3 %v593_v63  ;;  %v526_v12 = vld [vmem:[#allocation3 + $0x40] sm:$0x77]  ;;  %v712_v56 = vld [vmem:[%s2073_s3 + $0x1c8] sm:$0xff]  ;;  %v685_v58 = vld [vmem:[%s2073_s3 + $0xf0] sm:$0xff] }
  0xe4   :  { %v456_v24 = vrot.slane %v452_v47, 6  ;;  %v554_v20 = vunpack.c.l.b16 %v526_v12  ;;  %v555_v53 = vunpack.c.h.b16 %v526_v12  ;;  %v668_v47 = vld [vmem:[%s2073_s3 + $0x68] sm:$0xff]  ;;  %v694_v63 = vld [vmem:[%s2073_s3 + $0x138] sm:$0xff]  ;;  %v683_v12 = vld [vmem:[%s2073_s3 + $0xe0] sm:$0xff] }
  0xe5   :  { %v684_v62 = vld [vmem:[%s2073_s3 + $0xe8] sm:$0xff] }
  0xe6   :  { %460 = vst [vmem:[#allocation3 + $0x30] sm:$0xcc] %v456_v24  ;;  %v566_v14 = vpack.c.b16 %v554_v20, %v554_v20  ;;  %v567_v18 = vpack.c.b16 %v555_v53, %v555_v53  ;;  %v693_v24 = vld [vmem:[%s2073_s3 + $0x130] sm:$0xff]  ;;  %v666_v53 = vld [vmem:[%s2073_s3 + $0x58] sm:$0xff] }
  0xe7   :  { %v236_v38 = vpop.permute.xlu0 %235  ;;  %627 = vmatpush.bf16.msra.mxu2 %v1119_v4  ;;  %640 = vmatpush.bf16.msra.mxu3 %v1123_v5  ;;  %v709_v20 = vld [vmem:[%s2073_s3 + $0x1b0] sm:$0xff]  ;;  %v692_v4 = vld [vmem:[%s2073_s3 + $0x128] sm:$0xff] }
  0xe8   :  { %v244_v27 = vsel %vm243_vm13, %v1188_v2, %v236_v38  ;;  %v245_v19 = vsel %vm243_vm13, %v236_v38, %v1182_v3  ;;  %v584_v21 = vsel %vm582_vm6, %v566_v14, 0  ;;  %v587_v15 = vsel %vm582_vm6, %v567_v18, 0  ;;  %v718_v3 = vld [vmem:[%s2073_s3 + $0x1f8] sm:$0xff]  ;;  %v708_v5 = vld [vmem:[%s2073_s3 + $0x1a8] sm:$0xff]  ;;  %v679_v38 = vld [vmem:[%s2073_s3 + $0xc0] sm:$0xff] }
  0xe9   :  { %v252_v26 = vsel %vm1613_vm3, %v244_v27, 0.0  ;;  %v253_v23 = vsel %vm1617_vm7, %v245_v19, 0.0  ;;  %600 = vmatpush.bf16.msra.mxu0 %v584_v21  ;;  %613 = vmatpush.bf16.msra.mxu1 %v587_v15  ;;  %vm578_vm13 = vcmask 310272   ;;  %v682_v2 = vld [vmem:[%s2073_s3 + $0xd8] sm:$0xff]  ;;  %v680_v14 = vld [vmem:[%s2073_s3 + $0xc8] sm:$0xff]  ;;  %v661_v21 = vld [vmem:[%s2073_s3 + $0x30] sm:$0xff] }
  0xea   :  { %v256_v25 = vpack.c.bf16 %v253_v23, %v252_v26  ;;  %v690_v18 = vld [vmem:[%s2073_s3 + $0x118] sm:$0xff]  ;;  %v677_v15 = vld [vmem:[%s2073_s3 + $0xb0] sm:$0xff]  ;;  %v660_v26 = vld [vmem:[%s2073_s3 + $0x28] sm:$0xff] }
  0xeb   :  { %628 = vmatpush.bf16.msra.mxu2 %v1103_v9  ;;  %641 = vmatpush.bf16.msra.mxu3 %v1107_v13  ;;  %v662_v27 = vld [vmem:[%s2073_s3 + $0x38] sm:$0xff]  ;;  %v676_v23 = vld [vmem:[%s2073_s3 + $0xa8] sm:$0xff]  ;;  %v659_v9 = vld [vmem:[%s2073_s3 + $0x20] sm:$0xff] }
  0xec   :  { %v260_v29 = vrot.slane %v256_v25, 6  ;;  %v678_v19 = vld [vmem:[%s2073_s3 + $0xb8] sm:$0xff]  ;;  %v675_v13 = vld [vmem:[%s2073_s3 + $0xa0] sm:$0xff] }
  0xed   :  { %v1140_v32 = vld [vmem:[#allocation3 + $0x2c] sm:$0xf0]  ;;  %v1112_v35 = vld [vmem:[#allocation3 + $0x30] sm:$0xf0]  ;;  %v658_v25 = vld [vmem:[%s2073_s3 + $0x18] sm:$0xff] }
  0xee   :  { %264 = vst [vmem:[#allocation3 + $0x10] sm:$0xcc] %v260_v29  ;;  %1126 = vmatmul.msk.bf16.vlgmr.msra.gmra.mxu2 %vm578_vm13, %v517_v28  ;;  %1127 = vmatmul.msk.bf16.vlgmr.msra.gmra.mxu3 %vm578_vm13, %v517_v28  ;;  %v1111_v10 = vor.u32 %v1140_v32, %v1110_v8  ;;  %v1115_v22 = vor.u32 %v1138_v33, %v1112_v35  ;;  %v688_v29 = vld [vmem:[%s2073_s3 + $0x108] sm:$0xff]  ;;  %v705_v8 = vld [vmem:[%s2073_s3 + $0x190] sm:$0xff]  ;;  %v687_v32 = vld [vmem:[%s2073_s3 + $0x100] sm:$0xff] }
  0xef   :  { %759 = vmatpush.msrb.mxu2 %v702_v61  ;;  %779 = vmatpush.msrb.mxu3 %v718_v3  ;;  %v689_v61 = vld [vmem:[%s2073_s3 + $0x110] sm:$0xff]  ;;  %v706_v3 = vld [vmem:[%s2073_s3 + $0x198] sm:$0xff]  ;;  %v704_v33 = vld [vmem:[%s2073_s3 + $0x188] sm:$0xff] }
  0xf0   :  { %601 = vmatpush.bf16.msra.mxu0 %v1111_v10  ;;  %614 = vmatpush.bf16.msra.mxu1 %v1115_v22  ;;  %v656_v35 = vld [vmem:[%s2073_s3 + $0x8] sm:$0xff]  ;;  %v703_v22 = vld [vmem:[%s2073_s3 + $0x180] sm:$0xff] }
  0xf1   :  { %760 = vmatpush.msrb.mxu2 %v701_v54  ;;  %780 = vmatpush.msrb.mxu3 %v717_v31  ;;  %v657_v54 = vld [vmem:[%s2073_s3 + $0x10] sm:$0xff]  ;;  %v672_v10 = vld [vmem:[%s2073_s3 + $0x88] sm:$0xff] }
  0xf2   :  { %v673_v31 = vld [vmem:[%s2073_s3 + $0x90] sm:$0xff] }
  0xf3   :  { %761 = vmatpush.msrb.mxu2 %v700_v36  ;;  %781 = vmatpush.msrb.mxu3 %v716_v39  ;;  %v655_v36 = vld [vmem:[%s2073_s3] sm:$0xff] }
  0xf4   :  { %v671_v39 = vld [vmem:[%s2073_s3 + $0x80] sm:$0xff] }
  0xf5   :  { %762 = vmatpush.msrb.mxu2 %v699_v40  ;;  %782 = vmatpush.msrb.mxu3 %v715_v41  ;;  %v1136_v46 = vld [vmem:[#allocation3 + $0xc] sm:$0xf0]  ;;  %v1096_v49 = vld [vmem:[#allocation3 + $0x10] sm:$0xf0] }
  0xf6   :  { %v1095_v52 = vor.u32 %v1136_v46, %v1094_v44  ;;  %v1099_v55 = vor.u32 %v1134_v48, %v1096_v49 }
  0xf7   :  { %763 = vmatpush.msrb.mxu2 %v698_v42  ;;  %783 = vmatpush.msrb.mxu3 %v714_v43 }
  0xf8   :  { %602 = vmatpush.bf16.msra.mxu0 %v1095_v52  ;;  %615 = vmatpush.bf16.msra.mxu1 %v1099_v55 }
  0xf9   :  { %764 = vmatpush.msrb.mxu2 %v697_v45  ;;  %784 = vmatpush.msrb.mxu3 %v713_v30 }
  0xfb   :  { %765 = vmatpush.msrb.mxu2 %v696_v34  ;;  %785 = vmatpush.msrb.mxu3 %v712_v56 }
  0xfc   :  { %719 = vmatpush.msrb.mxu0 %v670_v16  ;;  %739 = vmatpush.msrb.mxu1 %v686_v17 }
  0xfd   :  { %1124 = vmatmul.msk.bf16.vlgmr.msra.gmra.mxu0 %vm578_vm13, %v517_v28  ;;  %1125 = vmatmul.msk.bf16.vlgmr.msra.gmra.mxu1 %vm578_vm13, %v517_v28  ;;  %v674_v28 = vld [vmem:[%s2073_s3 + $0x98] sm:$0xff] }
  0xfe   :  { %720 = vmatpush.msrb.mxu0 %v669_v57  ;;  %740 = vmatpush.msrb.mxu1 %v685_v58 }
  0xff   :  { %766 = vmatpush.msrb.mxu2 %v695_v59  ;;  %786 = vmatpush.msrb.mxu3 %v711_v60 }
 0x100   :  { %721 = vmatpush.msrb.mxu0 %v668_v47  ;;  %741 = vmatpush.msrb.mxu1 %v684_v62 }
 0x101   :  { %767 = vmatpush.msrb.mxu2 %v694_v63  ;;  %787 = vmatpush.msrb.mxu3 %v710_v51 }
 0x102   :  { %722 = vmatpush.msrb.mxu0 %v667_v50  ;;  %742 = vmatpush.msrb.mxu1 %v683_v12 }
 0x103   :  { %768 = vmatpush.msrb.mxu2 %v693_v24  ;;  %788 = vmatpush.msrb.mxu3 %v709_v20 }
 0x104   :  { %723 = vmatpush.msrb.mxu0 %v666_v53  ;;  %743 = vmatpush.msrb.mxu1 %v682_v2 }
 0x105   :  { %769 = vmatpush.msrb.mxu2 %v692_v4  ;;  %789 = vmatpush.msrb.mxu3 %v708_v5 }
 0x106   :  { %724 = vmatpush.msrb.mxu0 %v665_v6  ;;  %744 = vmatpush.msrb.mxu1 %v681_v7 }
 0x107   :  { %770 = vmatpush.msrb.mxu2 %v691_v0  ;;  %790 = vmatpush.msrb.mxu3 %v707_v1 }
 0x108   :  { %725 = vmatpush.msrb.mxu0 %v664_v11  ;;  %745 = vmatpush.msrb.mxu1 %v680_v14  ;;  %v916_v14 = vld [vmem:[%s2074_s4 + $0x78] sm:$0xff] }
 0x109   :  { %771 = vmatpush.msrb.mxu2 %v690_v18  ;;  %791 = vmatpush.msrb.mxu3 %v706_v3  ;;  %v932_v18 = vld [vmem:[%s2074_s4 + $0xf8] sm:$0xff]  ;;  %v929_v3 = vld [vmem:[%s2074_s4 + $0xe0] sm:$0xff] }
 0x10a   :  { %726 = vmatpush.msrb.mxu0 %v663_v37  ;;  %746 = vmatpush.msrb.mxu1 %v679_v38  ;;  %v948_v37 = vld [vmem:[%s2074_s4 + $0x178] sm:$0xff] }
 0x10b   :  { %772 = vmatpush.msrb.mxu2 %v689_v61  ;;  %792 = vmatpush.msrb.mxu3 %v705_v8  ;;  %v964_v38 = vld [vmem:[%s2074_s4 + $0x1f8] sm:$0xff]  ;;  %v913_v61 = vld [vmem:[%s2074_s4 + $0x60] sm:$0xff] }
 0x10c   :  { %727 = vmatpush.msrb.mxu0 %v662_v27  ;;  %747 = vmatpush.msrb.mxu1 %v678_v19  ;;  %v915_v27 = vld [vmem:[%s2074_s4 + $0x70] sm:$0xff] }
 0x10d   :  { %773 = vmatpush.msrb.mxu2 %v688_v29  ;;  %793 = vmatpush.msrb.mxu3 %v704_v33  ;;  %v931_v19 = vld [vmem:[%s2074_s4 + $0xf0] sm:$0xff]  ;;  %v912_v33 = vld [vmem:[%s2074_s4 + $0x58] sm:$0xff] }
 0x10e   :  { %728 = vmatpush.msrb.mxu0 %v661_v21  ;;  %748 = vmatpush.msrb.mxu1 %v677_v15  ;;  %v947_v21 = vld [vmem:[%s2074_s4 + $0x170] sm:$0xff] }
 0x10f   :  { %774 = vmatpush.msrb.mxu2 %v687_v32  ;;  %794 = vmatpush.msrb.mxu3 %v703_v22  ;;  %v963_v15 = vld [vmem:[%s2074_s4 + $0x1f0] sm:$0xff]  ;;  %v960_v22 = vld [vmem:[%s2074_s4 + $0x1d8] sm:$0xff] }
 0x110   :  { %729 = vmatpush.msrb.mxu0 %v660_v26  ;;  %749 = vmatpush.msrb.mxu1 %v676_v23  ;;  %v914_v26 = vld [vmem:[%s2074_s4 + $0x68] sm:$0xff] }
 0x111   :  { %1019 = vmatpush.msra.mxu2 %v948_v37  ;;  %1039 = vmatpush.msra.mxu3 %v964_v38  ;;  %v930_v23 = vld [vmem:[%s2074_s4 + $0xe8] sm:$0xff]  ;;  %v901_v37 = vld [vmem:[%s2074_s4] sm:$0xff] }
 0x112   :  { %730 = vmatpush.msrb.mxu0 %v659_v9  ;;  %750 = vmatpush.msrb.mxu1 %v675_v13  ;;  %v946_v9 = vld [vmem:[%s2074_s4 + $0x168] sm:$0xff]  ;;  %v917_v38 = vld [vmem:[%s2074_s4 + $0x80] sm:$0xff] }
 0x113   :  { %v962_v13 = vld [vmem:[%s2074_s4 + $0x1e8] sm:$0xff]  ;;  %1020 = vmatpush.msra.mxu2 %v947_v21  ;;  %1040 = vmatpush.msra.mxu3 %v963_v15 }
 0x114   :  { %731 = vmatpush.msrb.mxu0 %v658_v25  ;;  %751 = vmatpush.msrb.mxu1 %v674_v28  ;;  %v945_v25 = vld [vmem:[%s2074_s4 + $0x160] sm:$0xff] }
 0x115   :  { %v961_v28 = vld [vmem:[%s2074_s4 + $0x1e0] sm:$0xff]  ;;  %1021 = vmatpush.msra.mxu2 %v946_v9  ;;  %1041 = vmatpush.msra.mxu3 %v962_v13 }
 0x116   :  { %732 = vmatpush.msrb.mxu0 %v657_v54  ;;  %752 = vmatpush.msrb.mxu1 %v673_v31 }
 0x117   :  { %1022 = vmatpush.msra.mxu2 %v945_v25  ;;  %1042 = vmatpush.msra.mxu3 %v961_v28  ;;  %v1234_v28 = vld [vmem:[%s2075_s5] ss:$0 sm:$0xff] }
 0x118   :  { %733 = vmatpush.msrb.mxu0 %v656_v35  ;;  %753 = vmatpush.msrb.mxu1 %v672_v10  ;;  %v928_v35 = vld [vmem:[%s2074_s4 + $0xd8] sm:$0xff] }
 0x119   :  { %v944_v10 = vld [vmem:[%s2074_s4 + $0x158] sm:$0xff]  ;;  %1043 = vmatpush.msra.mxu3 %v960_v22 }
 0x11a   :  { %734 = vmatpush.msrb.mxu0 %v655_v36  ;;  %754 = vmatpush.msrb.mxu1 %v671_v39  ;;  %v911_v36 = vld [vmem:[%s2074_s4 + $0x50] sm:$0xff] }
 0x11b   :  { %v927_v39 = vld [vmem:[%s2074_s4 + $0xd0] sm:$0xff]  ;;  %1023 = vmatpush.msra.mxu2 %v944_v10 }
 0x11c   :  { %979 = vmatpush.msra.mxu0 %v916_v14  ;;  %999 = vmatpush.msra.mxu1 %v932_v18  ;;  %v934_v14 = vld [vmem:[%s2074_s4 + $0x108] sm:$0xff] }
 0x11d   :  { %v950_v18 = vld [vmem:[%s2074_s4 + $0x188] sm:$0xff] }
 0x11e   :  { %980 = vmatpush.msra.mxu0 %v915_v27  ;;  %1000 = vmatpush.msra.mxu1 %v931_v19  ;;  %v933_v27 = vld [vmem:[%s2074_s4 + $0x100] sm:$0xff] }
 0x11f   :  { %v949_v19 = vld [vmem:[%s2074_s4 + $0x180] sm:$0xff] }
 0x120   :  { %981 = vmatpush.msra.mxu0 %v914_v26  ;;  %1001 = vmatpush.msra.mxu1 %v930_v23 }
 0x122   :  { %982 = vmatpush.msra.mxu0 %v913_v61  ;;  %1002 = vmatpush.msra.mxu1 %v929_v3 }
 0x124   :  { %983 = vmatpush.msra.mxu0 %v912_v33  ;;  %1003 = vmatpush.msra.mxu1 %v928_v35 }
 0x126   :  { %984 = vmatpush.msra.mxu0 %v911_v36  ;;  %1004 = vmatpush.msra.mxu1 %v927_v39 }
 0x171   :  { %v630_v40 = vpop.f32.mrf.mxu2  ;;  %v643_v41 = vpop.f32.mrf.mxu3 }
 0x172   :  { %649 = vst [vmem:[%s2076_s6 + $0x10] sm:$0xff] %v630_v40  ;;  %v653_v42 = vmax.f32 %v630_v40, 0.0  ;;  %v654_v43 = vmax.f32 %v643_v41, 0.0  ;;  %v943_v40 = vld [vmem:[%s2074_s4 + $0x150] sm:$0xff] }
 0x173   :  { %650 = vst [vmem:[%s2076_s6 + $0x18] sm:$0xff] %v643_v41  ;;  %v959_v41 = vld [vmem:[%s2074_s4 + $0x1d0] sm:$0xff]  ;;  %1024 = vmatpush.msra.mxu2 %v943_v40 }
 0x174   :  { %775 = vmatmul.f32.vlgmr.msrb.gmra.mxu2 %v653_v42  ;;  %795 = vmatmul.f32.vlgmr.msrb.gmra.mxu3 %v654_v43  ;;  %v910_v42 = vld [vmem:[%s2074_s4 + $0x48] sm:$0xff] }
 0x175   :  { %v926_v43 = vld [vmem:[%s2074_s4 + $0xc8] sm:$0xff]  ;;  %1044 = vmatpush.msra.mxu3 %v959_v41  ;;  %985 = vmatpush.msra.mxu0 %v910_v42 }
 0x176   :  { %1005 = vmatpush.msra.mxu1 %v926_v43 }
 0x179   :  { %v632_v48 = vpop.f32.mrf.mxu2  ;;  %v645_v49 = vpop.f32.mrf.mxu3 }
 0x17a   :  { %v604_v44 = vpop.f32.mrf.mxu0  ;;  %v617_v45 = vpop.f32.mrf.mxu1  ;;  %v941_v48 = vld [vmem:[%s2074_s4 + $0x140] sm:$0xff] }
 0x17b   :  { %647 = vst [vmem:[%s2076_s6] sm:$0xff] %v604_v44  ;;  %v651_v30 = vmax.f32 %v604_v44, 0.0  ;;  %v652_v46 = vmax.f32 %v617_v45, 0.0  ;;  %v942_v44 = vld [vmem:[%s2074_s4 + $0x148] sm:$0xff]  ;;  %v957_v49 = vld [vmem:[%s2074_s4 + $0x1c0] sm:$0xff] }
 0x17c   :  { %648 = vst [vmem:[%s2076_s6 + $0x8] sm:$0xff] %v617_v45  ;;  %v958_v45 = vld [vmem:[%s2074_s4 + $0x1c8] sm:$0xff]  ;;  %1025 = vmatpush.msra.mxu2 %v942_v44 }
 0x17d   :  { %735 = vmatmul.f32.vlgmr.msrb.gmra.mxu0 %v651_v30  ;;  %755 = vmatmul.f32.vlgmr.msrb.gmra.mxu1 %v652_v46  ;;  %v909_v30 = vld [vmem:[%s2074_s4 + $0x40] sm:$0xff] }
 0x17e   :  { %v925_v46 = vld [vmem:[%s2074_s4 + $0xc0] sm:$0xff]  ;;  %1045 = vmatpush.msra.mxu3 %v958_v45  ;;  %986 = vmatpush.msra.mxu0 %v909_v30 }
 0x17f   :  { %1006 = vmatpush.msra.mxu1 %v925_v46  ;;  %1026 = vmatpush.msra.mxu2 %v941_v48 }
 0x180   :  { %1046 = vmatpush.msra.mxu3 %v957_v49 }
 0x182   :  { %v606_v52 = vpop.f32.mrf.mxu0  ;;  %v619_v55 = vpop.f32.mrf.mxu1 }
 0x183   :  { %v908_v55 = vld [vmem:[%s2074_s4 + $0x38] sm:$0xff] }
 0x184   :  { %987 = vmatpush.msra.mxu0 %v908_v55 }
 0x1f7   :  { %v776_v16 = vpop.f32.mrf.mxu2  ;;  %v796_v57 = vpop.f32.mrf.mxu3 }
 0x1fa   :  { %v736_v17 = vpop.f32.mrf.mxu0  ;;  %v756_v34 = vpop.f32.mrf.mxu1 }
 0x1fb   :  { %v757_v56 = vadd.f32 %v756_v34, %v736_v17  ;;  %v940_v17 = vld [vmem:[%s2074_s4 + $0x138] sm:$0xff] }
 0x1fc   :  { %v956_v34 = vld [vmem:[%s2074_s4 + $0x1b8] sm:$0xff]  ;;  %1027 = vmatpush.msra.mxu2 %v940_v17 }
 0x1fd   :  { %v777_v58 = vadd.f32 %v776_v16, %v757_v56  ;;  %v924_v16 = vld [vmem:[%s2074_s4 + $0xb8] sm:$0xff]  ;;  %1047 = vmatpush.msra.mxu3 %v956_v34  ;;  %v907_v56 = vld [vmem:[%s2074_s4 + $0x30] sm:$0xff] }
 0x1fe   :  { %1007 = vmatpush.msra.mxu1 %v924_v16  ;;  %988 = vmatpush.msra.mxu0 %v907_v56 }
 0x1ff   :  { %v797_v59 = vadd.f32 %v796_v57, %v777_v58  ;;  %v923_v57 = vld [vmem:[%s2074_s4 + $0xb0] sm:$0xff] }
 0x200   :  { %v939_v58 = vld [vmem:[%s2074_s4 + $0x130] sm:$0xff]  ;;  %1008 = vmatpush.msra.mxu1 %v923_v57 }
 0x201   :  { %799 = vst [vmem:[%s2077_s7] sm:$0xff] %v797_v59  ;;  %852 = vrot.lane.b32.xlu0 %v797_v59, %s1271_s21  ;;  %v803_v60 = vrot.slane %v797_v59, 7  ;;  %1028 = vmatpush.msra.mxu2 %v939_v58 }
 0x202   :  { %810 = vst.sshfl [vmem:[#allocation1] sm:$0xff pattern:$0x73625140] %v797_v59 }
 0x203   :  { %v804_v47 = vrot.slane %v803_v60, 2  ;;  %801 = vst.msk [vmem:[#allocation4] sm:$0x1] %vm800_vm8, %v797_v59  ;;  %v906_v60 = vld [vmem:[%s2074_s4 + $0x28] sm:$0xff] }
 0x204   :  { %989 = vmatpush.msra.mxu0 %v906_v60 }
 0x205   :  { %805 = vrot.lane.b32.xlu1 %v804_v47, %s1271_s21 }
 0x209   :  { %v812_v62 = vld [vmem:[#allocation1 + $0x1] ss:$4 sm:$0xff] }
 0x20a   :  { %815 = vst.sshfl [vmem:[#allocation1] sm:$0xff pattern:$0x73625140] %v797_v59 }
 0x20b   :  { %814 = vst.msk [vmem:[#allocation4 + $0x2] sm:$0x1] %vm800_vm8, %v812_v62  ;;  %v938_v62 = vld [vmem:[%s2074_s4 + $0x128] sm:$0xff] }
 0x20c   :  { %1029 = vmatpush.msra.mxu2 %v938_v62 }
 0x211   :  { %v817_v63 = vld [vmem:[#allocation1 + $0x1] ss:$4 sm:$0xff] }
 0x212   :  { %824 = vst.sshfl [vmem:[#allocation1] sm:$0xff pattern:$0x73625140] %v797_v59  ;;  %v1128_v5 = vrot.slane %v817_v63, 9  ;;  %v954_v63 = vld [vmem:[%s2074_s4 + $0x1a8] sm:$0xff] }
 0x219   :  { %v826_v51 = vld [vmem:[#allocation1 + $0x2] ss:$4 sm:$0xff] }
 0x21a   :  { %829 = vst.sshfl [vmem:[#allocation1] sm:$0xff pattern:$0x73625140] %v797_v59 }
 0x21b   :  { %828 = vst.msk [vmem:[#allocation4 + $0x4] sm:$0x1] %vm800_vm8, %v826_v51  ;;  %v905_v51 = vld [vmem:[%s2074_s4 + $0x20] sm:$0xff] }
 0x21c   :  { %990 = vmatpush.msra.mxu0 %v905_v51 }
 0x221   :  { %v831_v50 = vld [vmem:[#allocation1 + $0x2] ss:$4 sm:$0xff] }
 0x222   :  { %838 = vst.sshfl [vmem:[#allocation1] sm:$0xff pattern:$0x73625140] %v797_v59  ;;  %v1129_v0 = vrot.slane %v831_v50, 9  ;;  %v921_v50 = vld [vmem:[%s2074_s4 + $0xa0] sm:$0xff] }
 0x229   :  { %v840_v12 = vld [vmem:[#allocation1 + $0x3] ss:$4 sm:$0xff] }
 0x22a   :  { %843 = vst.sshfl [vmem:[#allocation1] sm:$0xff pattern:$0x73625140] %v797_v59 }
 0x22b   :  { %842 = vst.msk [vmem:[#allocation4 + $0x6] sm:$0x1] %vm800_vm8, %v840_v12  ;;  %v937_v12 = vld [vmem:[%s2074_s4 + $0x120] sm:$0xff] }
 0x22c   :  { %1030 = vmatpush.msra.mxu2 %v937_v12 }
 0x231   :  { %v845_v24 = vld [vmem:[#allocation1 + $0x3] ss:$4 sm:$0xff] }
 0x232   :  { %858 = vst.sshfl [vmem:[#allocation1] sm:$0xff pattern:$0x73625140] %v797_v59  ;;  %v1130_v53 = vrot.slane %v845_v24, 9  ;;  %v953_v24 = vld [vmem:[%s2074_s4 + $0x1a0] sm:$0xff] }
 0x239   :  { %v860_v20 = vld [vmem:[#allocation1 + $0x1] ss:$4 sm:$0xff] }
 0x23a   :  { %865 = vst.sshfl [vmem:[#allocation1] sm:$0xff pattern:$0x73625140] %v797_v59  ;;  %861 = vrot.lane.b32.xlu1 %v860_v20, %s1271_s21  ;;  %v904_v20 = vld [vmem:[%s2074_s4 + $0x18] sm:$0xff] }
 0x23b   :  { %991 = vmatpush.msra.mxu0 %v904_v20 }
 0x241   :  { %v1852_v2 = vld [vmem:[#allocation1 + $0x1] ss:$4 sm:$0xff] }
 0x242   :  { %872 = vst.sshfl [vmem:[#allocation1] sm:$0xff pattern:$0x73625140] %v797_v59  ;;  %848 = vrot.lane.b32.xlu1 %v1130_v53, %s1271_s21  ;;  %v1131_v32 = vrot.slane %v1852_v2, 9  ;;  %v920_v53 = vld [vmem:[%s2074_s4 + $0x98] sm:$0xff] }
 0x243   :  { %v936_v2 = vld [vmem:[%s2074_s4 + $0x118] sm:$0xff] }
 0x244   :  { %1031 = vmatpush.msra.mxu2 %v936_v2 }
 0x249   :  { %v874_v4 = vld [vmem:[#allocation1 + $0x2] ss:$4 sm:$0xff] }
 0x24a   :  { %875 = vrot.lane.b32.xlu2 %v874_v4, %s1271_s21  ;;  %879 = vst.sshfl [vmem:[#allocation1] sm:$0xff pattern:$0x73625140] %v797_v59  ;;  %v952_v4 = vld [vmem:[%s2074_s4 + $0x198] sm:$0xff] }
 0x251   :  { %v881_v6 = vld [vmem:[#allocation1 + $0x2] ss:$4 sm:$0xff] }
 0x252   :  { %886 = vst.sshfl [vmem:[#allocation1] sm:$0xff pattern:$0x73625140] %v797_v59  ;;  %820 = vrot.lane.b32.xlu2 %v1128_v5, %s1271_s21  ;;  %v1132_v8 = vrot.slane %v881_v6, 9  ;;  %v903_v5 = vld [vmem:[%s2074_s4 + $0x10] sm:$0xff] }
 0x253   :  { %v919_v6 = vld [vmem:[%s2074_s4 + $0x90] sm:$0xff]  ;;  %992 = vmatpush.msra.mxu0 %v903_v5 }
 0x259   :  { %v888_v7 = vld [vmem:[#allocation1 + $0x3] ss:$4 sm:$0xff] }
 0x25a   :  { %889 = vrot.lane.b32.xlu0 %v888_v7, %s1271_s21  ;;  %893 = vst.sshfl [vmem:[#allocation1] sm:$0xff pattern:$0x73625140] %v797_v59  ;;  %v955_v59 = vld [vmem:[%s2074_s4 + $0x1b0] sm:$0xff] }
 0x25b   :  { %1048 = vmatpush.msra.mxu3 %v955_v59  ;;  %v935_v7 = vld [vmem:[%s2074_s4 + $0x110] sm:$0xff] }
 0x25c   :  { %1032 = vmatpush.msra.mxu2 %v935_v7 }
 0x25d   :  { %1049 = vmatpush.msra.mxu3 %v954_v63 }
 0x25e   :  { %1033 = vmatpush.msra.mxu2 %v934_v14 }
 0x25f   :  { %1050 = vmatpush.msra.mxu3 %v953_v24 }
 0x260   :  { %1034 = vmatpush.msra.mxu2 %v933_v27 }
 0x261   :  { %1051 = vmatpush.msra.mxu3 %v952_v4  ;;  %v895_v21 = vld [vmem:[#allocation1 + $0x3] ss:$4 sm:$0xff] }
 0x262   :  { %834 = vrot.lane.b32.xlu0 %v1129_v0, %s1271_s21  ;;  %v951_v0 = vld [vmem:[%s2074_s4 + $0x190] sm:$0xff]  ;;  %v1133_v26 = vrot.slane %v895_v21, 9 }
 0x263   :  { %1052 = vmatpush.msra.mxu3 %v951_v0 }
 0x265   :  { %1053 = vmatpush.msra.mxu3 %v950_v18 }
 0x267   :  { %1054 = vmatpush.msra.mxu3 %v949_v19 }
 0x273   :  { %v853_v1 = vpop.permute.xlu0 %852 }
 0x274   :  { %855 = vst.msk [vmem:[#allocation4 + $0x1] sm:$0x1] %vm800_vm8, %v853_v1  ;;  %v902_v1 = vld [vmem:[%s2074_s4 + $0x8] sm:$0xff] }
 0x275   :  { %857 = vst.msk [vmem:[#allocation4 + $0x1] sm:$0x1] %vm808_vm9, %v804_v47  ;;  %v922_v47 = vld [vmem:[%s2074_s4 + $0xa8] sm:$0xff]  ;;  %993 = vmatpush.msra.mxu0 %v902_v1 }
 0x276   :  { %1009 = vmatpush.msra.mxu1 %v922_v47 }
 0x277   :  { %v806_v11 = vpop.permute.xlu1 %805  ;;  %994 = vmatpush.msra.mxu0 %v901_v37 }
 0x278   :  { %809 = vst.msk [vmem:[#allocation4] sm:$0x1] %vm808_vm9, %v806_v11  ;;  %1010 = vmatpush.msra.mxu1 %v921_v50  ;;  %v918_v11 = vld [vmem:[%s2074_s4 + $0x88] sm:$0xff] }
 0x27a   :  { %1011 = vmatpush.msra.mxu1 %v920_v53 }
 0x27c   :  { %1012 = vmatpush.msra.mxu1 %v919_v6 }
 0x27e   :  { %1013 = vmatpush.msra.mxu1 %v918_v11 }
 0x280   :  { %1014 = vmatpush.msra.mxu1 %v917_v38 }
 0x2a4   :  { %v876_v29 = vpop.permute.xlu2 %875 }
 0x2a5   :  { %878 = vst.msk [vmem:[#allocation4 + $0x5] sm:$0x1] %vm800_vm8, %v876_v29 }
 0x2a6   :  { %885 = vst.msk [vmem:[#allocation4 + $0x5] sm:$0x1] %vm808_vm9, %v1132_v8 }
 0x2ac   :  { %v821_v54 = vpop.permute.xlu2 %820  ;;  %v862_v31 = vpop.permute.xlu1 %861 }
 0x2ad   :  { %823 = vst.msk [vmem:[#allocation4 + $0x2] sm:$0x1] %vm808_vm9, %v821_v54 }
 0x2ae   :  { %864 = vst.msk [vmem:[#allocation4 + $0x3] sm:$0x1] %vm800_vm8, %v862_v31 }
 0x2af   :  { %871 = vst.msk [vmem:[#allocation4 + $0x3] sm:$0x1] %vm808_vm9, %v1131_v32 }
 0x2b4   :  { %v849_v52 = vpop.permute.xlu1 %848 }
 0x2b5   :  { %851 = vst.msk [vmem:[#allocation4 + $0x6] sm:$0x1] %vm808_vm9, %v849_v52 }
 0x2cc   :  { %v890_v15 = vpop.permute.xlu0 %889 }
 0x2cd   :  { %892 = vst.msk [vmem:[#allocation4 + $0x7] sm:$0x1] %vm800_vm8, %v890_v15 }
 0x2ce   :  { %899 = vst.msk [vmem:[#allocation4 + $0x7] sm:$0x1] %vm808_vm9, %v1133_v26 }
 0x2d4   :  { %v835_v23 = vpop.permute.xlu0 %834 }
 0x2d5   :  { %837 = vst.msk [vmem:[#allocation4 + $0x4] sm:$0x1] %vm808_vm9, %v835_v23 }
 0x2dc   :  { %v900_v9 = vld [vmem:[#allocation4] sm:$0xff] }
 0x2dd   :  { %970 = vst [vmem:[#allocation1] ss:$4 sm:$0xff] %v900_v9 }
 0x2e4   :  { %v971_v13 = vld.sshfl [vmem:[#allocation1] sm:$0xff pattern:$0x73625140]  ;;  %v972_v61 = vld.sshfl [vmem:[#allocation1 + $0x8] sm:$0xff pattern:$0x73625140] }
 0x2e5   :  { %995 = vmatmul.f32.vlgmr.msra.gmra.mxu0 %v971_v13  ;;  %1015 = vmatmul.f32.vlgmr.msra.gmra.mxu1 %v972_v61  ;;  %v973_v3 = vld.sshfl [vmem:[#allocation1 + $0x10] sm:$0xff pattern:$0x73625140]  ;;  %v974_v25 = vld.sshfl [vmem:[#allocation1 + $0x18] sm:$0xff pattern:$0x73625140] }
 0x2e6   :  { %1035 = vmatmul.f32.vlgmr.msra.gmra.mxu2 %v973_v3  ;;  %1055 = vmatmul.f32.vlgmr.msra.gmra.mxu3 %v974_v25 }
 0x362   :  { %v996_v29 = vpop.f32.mrf.mxu0  ;;  %v1016_v54 = vpop.f32.mrf.mxu1 }
 0x363   :  { %v997_v8 = vadd.f32 %v1234_v28, %v996_v29 }
 0x365   :  { %v1017_v31 = vadd.f32 %v1016_v54, %v997_v8 }
 0x369   :  { %v1036_v32 = vpop.f32.mrf.mxu2  ;;  %v1056_v35 = vpop.f32.mrf.mxu3 }
 0x36a   :  { %v1037_v33 = vadd.f32 %v1036_v32, %v1017_v31 }
 0x36c   :  { %v1057_v10 = vadd.f32 %v1056_v35, %v1037_v33 }
 0x36e   :  { %1060 = vst.msk [vmem:[#allocation5] sm:$0x3] %vm1059_vm11, %v1057_v10 }
 0x36f   :  { %1075 = dma.vmem_to_hbm [thread:$0]  %s1071_s14, 32, %s1073_s17, [#allocation6]  }
 0x370   :  { %1259 = dma.done.wait [#allocation6], 32  }
 0x371   :  { %1260 = vsyncadd [#allocation6], 4294967264 }
 0x372   :  { %1084 = vsyncpa [#allocation6], 1 }

</bundles_post_ra>
